<compile_context>
chip_gen: v7x
topology: tpu7x:2x2x1
jax: 0.10.0
libtpu: 0.0.40
codegen_flags: <defaults>
</compile_context>

<pallas_src>
import jax
import jax.numpy as jnp
from jax.experimental import pallas as pl
from jax.experimental.pallas import tpu as pltpu

LANE = 128


def _round_up(x, m):
    return (x + m - 1) // m * m


def _num_tensorcores_per_chip():
    """v7x has 2 TensorCores per chip; v5e / v6e have 1."""
    try:
        kind = jax.devices()[0].device_kind.lower()
    except Exception:
        return 1
    return 2 if ("v7" in kind or "7x" in kind) else 1


def mlp_kernel(x_ref, w1_ref, b1_ref, w2_ref, b2_ref,
               w3_ref, b3_ref, w4_ref, b4_ref, out_ref):
    # bf16 inputs -> MXU, f32 accumulation; biases are f32.
    h = jnp.dot(x_ref[...], w1_ref[...],
                preferred_element_type=jnp.float32) + b1_ref[...]
    h = jnp.maximum(h, 0.0).astype(jnp.bfloat16)

    h = jnp.dot(h, w2_ref[...],
                preferred_element_type=jnp.float32) + b2_ref[...]
    h = jnp.maximum(h, 0.0).astype(jnp.bfloat16)

    h = jnp.dot(h, w3_ref[...],
                preferred_element_type=jnp.float32) + b3_ref[...]
    h = jnp.maximum(h, 0.0).astype(jnp.bfloat16)

    out = jnp.dot(h, w4_ref[...],
                  preferred_element_type=jnp.float32) + b4_ref[...]
    out_ref[...] = out.astype(out_ref.dtype)


def init_params(key, in_dim, hidden, num_classes):
    """Deterministic init mirroring nn.Linear's uniform(-1/sqrt(fan_in), 1/sqrt(fan_in))."""
    dims = [(in_dim, hidden), (hidden, hidden), (hidden, hidden), (hidden, num_classes)]
    params = {}
    for i, (fan_in, fan_out) in enumerate(dims, start=1):
        key, kw, kb = jax.random.split(key, 3)
        bound = 1.0 / jnp.sqrt(jnp.float32(fan_in))
        params[f"w{i}"] = jax.random.uniform(
            kw, (fan_in, fan_out), jnp.float32, minval=-bound, maxval=bound)
        params[f"b{i}"] = jax.random.uniform(
            kb, (1, fan_out), jnp.float32, minval=-bound, maxval=bound)
    return params


def prepare_params(params):
    """One-time weight prep, hoisted OUT of the per-call forward path:
    bf16-cast the weights and pad the final layer out to a full 128-lane slab.
    Returns (prepared_params, num_classes)."""
    num_classes = params["w4"].shape[1]
    n_pad = _round_up(num_classes, LANE)
    prep = {
        "w1": params["w1"].astype(jnp.bfloat16),
        "w2": params["w2"].astype(jnp.bfloat16),
        "w3": params["w3"].astype(jnp.bfloat16),
        "w4": jnp.pad(params["w4"],
                      ((0, 0), (0, n_pad - num_classes))).astype(jnp.bfloat16),
        "b1": params["b1"],
        "b2": params["b2"],
        "b3": params["b3"],
        "b4": jnp.pad(params["b4"], ((0, 0), (0, n_pad - num_classes))),
    }
    # TODO(synk): optional fp8 (v7x) / int8 (v5e/v6e) quantization of w2/w3
    # would halve the dominant weight DMA but needs accuracy validation.
    return prep, num_classes


def mlp_forward(x, prep, num_classes, *, tm=None):
    """x: (B, ...) -> flattened to (B, D). prep: output of prepare_params."""
    B = x.shape[0]
    x2d = x.reshape(B, -1).astype(jnp.bfloat16)     # nn.Flatten() + MXU dtype
    D = x2d.shape[1]

    hidden = prep["w1"].shape[1]
    n_pad = prep["w4"].shape[1]

    # Per-generation M-tiling:
    #  * single-TC (v5e/v6e): one grid step, full-extent batch block, no pad.
    #  * v7x (2 TCs): even >=2-step grid so the "parallel" axis shards.
    num_tc = _num_tensorcores_per_chip()
    if tm is None:
        if num_tc <= 1:
            b_pad = B
            tm = B
        else:
            b_pad = _round_up(B, 8 * num_tc)
            tm = b_pad // num_tc
    else:
        b_pad = _round_up(max(B, tm), tm)

    if b_pad != B:
        x2d = jnp.pad(x2d, ((0, b_pad - B), (0, 0)))
    grid = (b_pad // tm,)

    # Weights/biases: constant index_map -> VMEM-resident, DMA'd once.
    def resident(shape):
        return pl.BlockSpec(shape, lambda i: (0,) * len(shape))

    flops = 2 * b_pad * (D * hidden + 2 * hidden * hidden + hidden * n_pad)
    bytes_accessed = (
        x2d.size * 2
        + (prep["w1"].size + prep["w2"].size + prep["w3"].size + prep["w4"].size) * 2
        + (prep["b1"].size + prep["b2"].size + prep["b3"].size + prep["b4"].size) * 4
        + b_pad * n_pad * 4)

    out = pl.pallas_call(
        mlp_kernel,
        out_shape=jax.ShapeDtypeStruct((b_pad, n_pad), jnp.float32),
        grid_spec=pltpu.PrefetchScalarGridSpec(
            num_scalar_prefetch=0,
            grid=grid,
            in_specs=[
                pl.BlockSpec((tm, D), lambda i: (i, 0)),   # activations tile on M
                resident(prep["w1"].shape), resident(prep["b1"].shape),
                resident(prep["w2"].shape), resident(prep["b2"].shape),
                resident(prep["w3"].shape), resident(prep["b3"].shape),
                resident(prep["w4"].shape), resident(prep["b4"].shape),
            ],
            out_specs=pl.BlockSpec((tm, n_pad), lambda i: (i, 0)),
        ),
        compiler_params=pltpu.CompilerParams(
            dimension_semantics=("parallel",),
        ),
        cost_estimate=pl.CostEstimate(
            flops=flops, transcendentals=0, bytes_accessed=bytes_accessed),
    )(x2d, prep["w1"], prep["b1"], prep["w2"], prep["b2"],
      prep["w3"], prep["b3"], prep["w4"], prep["b4"])

    return out[:B, :num_classes]


def mlp_reference(x, params):
    """Pure-JAX reference with identical bf16-input / f32-accum numerics."""
    B = x.shape[0]
    h = x.reshape(B, -1).astype(jnp.bfloat16)

    def layer(h, w, b, relu):
        y = jnp.dot(h, w.astype(jnp.bfloat16),
                    preferred_element_type=jnp.float32) + b
        if relu:
            y = jnp.maximum(y, 0.0).astype(jnp.bfloat16)
        return y

    h = layer(h, params["w1"], params["b1"], True)
    h = layer(h, params["w2"], params["b2"], True)
    h = layer(h, params["w3"], params["b3"], True)
    return layer(h, params["w4"], params["b4"], False)


if __name__ == "__main__":
    fourier_order = 8          # input features = fourier_order * 4 = 32
    num_classes = 10
    hidden = 512
    batch = 64                 # small, MXU/lane friendly on every generation
    in_dim = fourier_order * 4

    key = jax.random.PRNGKey(0)
    key, kx = jax.random.split(key)
    # Input shaped (B, fourier_order, 4); Flatten collapses trailing dims.
    x = jax.random.normal(kx, (batch, fourier_order, 4), jnp.float32)

    params = init_params(key, in_dim, hidden, num_classes)

    # One-time weight prep (hoisted out of the forward path).
    prep, n_classes = prepare_params(params)
    prep = jax.block_until_ready(prep)

    out = mlp_forward(x, prep, n_classes)
    out = jax.block_until_ready(out)

    ref = mlp_reference(x, params)
    assert out.shape == (batch, num_classes), out.shape
    assert jnp.allclose(out, ref, atol=1e-2, rtol=1e-2), (
        "mismatch vs reference: max abs diff = %g"
        % float(jnp.max(jnp.abs(out - ref))))

    print("KERNEL_OK")
</pallas_src>

<mosaic_0001>
module attributes {stable_mosaic.version = 11 : i64} {
  func.func @mlp_kernel(%arg0: i32, %arg1: memref<64x32xbf16, #tpu.memory_space<vmem>>, %arg2: memref<32x512xbf16, #tpu.memory_space<vmem>>, %arg3: memref<1x512xf32, #tpu.memory_space<vmem>>, %arg4: memref<512x512xbf16, #tpu.memory_space<vmem>>, %arg5: memref<1x512xf32, #tpu.memory_space<vmem>>, %arg6: memref<512x512xbf16, #tpu.memory_space<vmem>>, %arg7: memref<1x512xf32, #tpu.memory_space<vmem>>, %arg8: memref<512x128xbf16, #tpu.memory_space<vmem>>, %arg9: memref<1x128xf32, #tpu.memory_space<vmem>>, %arg10: memref<64x128xf32, #tpu.memory_space<vmem>>) attributes {dimension_semantics = [#tpu.dimension_semantics<parallel>], iteration_bounds = array<i64: 1>, scalar_prefetch = 0 : i64, scratch_operands = 0 : i64, tpu.core_type = #tpu.core_type<tc>, window_params = [{transform_indices = @transform_0, window_bounds = array<i64: 64, 32>}, {pipeline_mode = #tpu.pipeline_mode<synchronous>, transform_indices = @transform_1, window_bounds = array<i64: 32, 512>}, {pipeline_mode = #tpu.pipeline_mode<synchronous>, transform_indices = @transform_2, window_bounds = array<i64: 1, 512>}, {pipeline_mode = #tpu.pipeline_mode<synchronous>, transform_indices = @transform_3, window_bounds = array<i64: 512, 512>}, {pipeline_mode = #tpu.pipeline_mode<synchronous>, transform_indices = @transform_4, window_bounds = array<i64: 1, 512>}, {pipeline_mode = #tpu.pipeline_mode<synchronous>, transform_indices = @transform_5, window_bounds = array<i64: 512, 512>}, {pipeline_mode = #tpu.pipeline_mode<synchronous>, transform_indices = @transform_6, window_bounds = array<i64: 1, 512>}, {pipeline_mode = #tpu.pipeline_mode<synchronous>, transform_indices = @transform_7, window_bounds = array<i64: 512, 128>}, {pipeline_mode = #tpu.pipeline_mode<synchronous>, transform_indices = @transform_8, window_bounds = array<i64: 1, 128>}, {transform_indices = @transform_9, window_bounds = array<i64: 64, 128>}]} {
    %c0 = arith.constant 0 : index
    %c0_0 = arith.constant 0 : index
    %0 = vector.load %arg1[%c0, %c0_0] : memref<64x32xbf16, #tpu.memory_space<vmem>>, vector<64x32xbf16>
    %c0_1 = arith.constant 0 : index
    %c0_2 = arith.constant 0 : index
    %1 = vector.load %arg2[%c0_1, %c0_2] : memref<32x512xbf16, #tpu.memory_space<vmem>>, vector<32x512xbf16>
    %cst = arith.constant dense<0.000000e+00> : vector<64x512xf32>
    %2 = tpu.matmul %0, %1, %cst {dimension_numbers = #tpu.dot_dimension_numbers<[1], [0], [0], [1], [0, 0, 1, 1], [], []>} : vector<64x32xbf16>, vector<32x512xbf16>, vector<64x512xf32> -> vector<64x512xf32>
    %c0_3 = arith.constant 0 : index
    %c0_4 = arith.constant 0 : index
    %3 = vector.load %arg3[%c0_3, %c0_4] : memref<1x512xf32, #tpu.memory_space<vmem>>, vector<1x512xf32>
    %4 = vector.broadcast %3 : vector<1x512xf32> to vector<64x512xf32>
    %5 = arith.addf %2, %4 : vector<64x512xf32>
    %cst_5 = arith.constant 0.000000e+00 : f32
    %6 = vector.broadcast %cst_5 : f32 to vector<64x512xf32>
    %7 = arith.maximumf %5, %6 : vector<64x512xf32>
    %8 = arith.truncf %7 : vector<64x512xf32> to vector<64x512xbf16>
    %c0_6 = arith.constant 0 : index
    %c0_7 = arith.constant 0 : index
    %9 = vector.load %arg4[%c0_6, %c0_7] : memref<512x512xbf16, #tpu.memory_space<vmem>>, vector<512x512xbf16>
    %cst_8 = arith.constant dense<0.000000e+00> : vector<64x512xf32>
    %10 = tpu.matmul %8, %9, %cst_8 {dimension_numbers = #tpu.dot_dimension_numbers<[1], [0], [0], [1], [0, 0, 1, 1], [], []>} : vector<64x512xbf16>, vector<512x512xbf16>, vector<64x512xf32> -> vector<64x512xf32>
    %c0_9 = arith.constant 0 : index
    %c0_10 = arith.constant 0 : index
    %11 = vector.load %arg5[%c0_9, %c0_10] : memref<1x512xf32, #tpu.memory_space<vmem>>, vector<1x512xf32>
    %12 = vector.broadcast %11 : vector<1x512xf32> to vector<64x512xf32>
    %13 = arith.addf %10, %12 : vector<64x512xf32>
    %cst_11 = arith.constant 0.000000e+00 : f32
    %14 = vector.broadcast %cst_11 : f32 to vector<64x512xf32>
    %15 = arith.maximumf %13, %14 : vector<64x512xf32>
    %16 = arith.truncf %15 : vector<64x512xf32> to vector<64x512xbf16>
    %c0_12 = arith.constant 0 : index
    %c0_13 = arith.constant 0 : index
    %17 = vector.load %arg6[%c0_12, %c0_13] : memref<512x512xbf16, #tpu.memory_space<vmem>>, vector<512x512xbf16>
    %cst_14 = arith.constant dense<0.000000e+00> : vector<64x512xf32>
    %18 = tpu.matmul %16, %17, %cst_14 {dimension_numbers = #tpu.dot_dimension_numbers<[1], [0], [0], [1], [0, 0, 1, 1], [], []>} : vector<64x512xbf16>, vector<512x512xbf16>, vector<64x512xf32> -> vector<64x512xf32>
    %c0_15 = arith.constant 0 : index
    %c0_16 = arith.constant 0 : index
    %19 = vector.load %arg7[%c0_15, %c0_16] : memref<1x512xf32, #tpu.memory_space<vmem>>, vector<1x512xf32>
    %20 = vector.broadcast %19 : vector<1x512xf32> to vector<64x512xf32>
    %21 = arith.addf %18, %20 : vector<64x512xf32>
    %cst_17 = arith.constant 0.000000e+00 : f32
    %22 = vector.broadcast %cst_17 : f32 to vector<64x512xf32>
    %23 = arith.maximumf %21, %22 : vector<64x512xf32>
    %24 = arith.truncf %23 : vector<64x512xf32> to vector<64x512xbf16>
    %c0_18 = arith.constant 0 : index
    %c0_19 = arith.constant 0 : index
    %25 = vector.load %arg8[%c0_18, %c0_19] : memref<512x128xbf16, #tpu.memory_space<vmem>>, vector<512x128xbf16>
    %cst_20 = arith.constant dense<0.000000e+00> : vector<64x128xf32>
    %26 = tpu.matmul %24, %25, %cst_20 {dimension_numbers = #tpu.dot_dimension_numbers<[1], [0], [0], [1], [0, 0, 1, 1], [], []>} : vector<64x512xbf16>, vector<512x128xbf16>, vector<64x128xf32> -> vector<64x128xf32>
    %c0_21 = arith.constant 0 : index
    %c0_22 = arith.constant 0 : index
    %27 = vector.load %arg9[%c0_21, %c0_22] : memref<1x128xf32, #tpu.memory_space<vmem>>, vector<1x128xf32>
    %28 = vector.broadcast %27 : vector<1x128xf32> to vector<64x128xf32>
    %29 = arith.addf %26, %28 : vector<64x128xf32>
    %c0_23 = arith.constant 0 : index
    %c0_24 = arith.constant 0 : index
    %30 = vector.load %arg10[%c0_23, %c0_24] : memref<64x128xf32, #tpu.memory_space<vmem>>, vector<64x128xf32>
    tpu.vector_store %arg10[%c0_23, %c0_24], %29 {strides = array<i32>} : memref<64x128xf32, #tpu.memory_space<vmem>>, vector<64x128xf32>,
    return
  }
  func.func @transform_0(%arg0: i32) -> (i32, i32) {
    %c0_i32 = arith.constant 0 : i32
    %c0_i32_0 = arith.constant 0 : i32
    return %arg0, %c0_i32 : i32, i32
  }
  func.func @transform_1(%arg0: i32) -> (i32, i32) {
    %c0_i32 = arith.constant 0 : i32
    %c0_i32_0 = arith.constant 0 : i32
    %c0_i32_1 = arith.constant 0 : i32
    return %c0_i32, %c0_i32_0 : i32, i32
  }
  func.func @transform_2(%arg0: i32) -> (i32, i32) {
    %c0_i32 = arith.constant 0 : i32
    %c0_i32_0 = arith.constant 0 : i32
    %c0_i32_1 = arith.constant 0 : i32
    return %c0_i32, %c0_i32_0 : i32, i32
  }
  func.func @transform_3(%arg0: i32) -> (i32, i32) {
    %c0_i32 = arith.constant 0 : i32
    %c0_i32_0 = arith.constant 0 : i32
    %c0_i32_1 = arith.constant 0 : i32
    return %c0_i32, %c0_i32_0 : i32, i32
  }
  func.func @transform_4(%arg0: i32) -> (i32, i32) {
    %c0_i32 = arith.constant 0 : i32
    %c0_i32_0 = arith.constant 0 : i32
    %c0_i32_1 = arith.constant 0 : i32
    return %c0_i32, %c0_i32_0 : i32, i32
  }
  func.func @transform_5(%arg0: i32) -> (i32, i32) {
    %c0_i32 = arith.constant 0 : i32
    %c0_i32_0 = arith.constant 0 : i32
    %c0_i32_1 = arith.constant 0 : i32
    return %c0_i32, %c0_i32_0 : i32, i32
  }
  func.func @transform_6(%arg0: i32) -> (i32, i32) {
    %c0_i32 = arith.constant 0 : i32
    %c0_i32_0 = arith.constant 0 : i32
    %c0_i32_1 = arith.constant 0 : i32
    return %c0_i32, %c0_i32_0 : i32, i32
  }
  func.func @transform_7(%arg0: i32) -> (i32, i32) {
    %c0_i32 = arith.constant 0 : i32
    %c0_i32_0 = arith.constant 0 : i32
    %c0_i32_1 = arith.constant 0 : i32
    return %c0_i32, %c0_i32_0 : i32, i32
  }
  func.func @transform_8(%arg0: i32) -> (i32, i32) {
    %c0_i32 = arith.constant 0 : i32
    %c0_i32_0 = arith.constant 0 : i32
    %c0_i32_1 = arith.constant 0 : i32
    return %c0_i32, %c0_i32_0 : i32, i32
  }
  func.func @transform_9(%arg0: i32) -> (i32, i32) {
    %c0_i32 = arith.constant 0 : i32
    %c0_i32_0 = arith.constant 0 : i32
    return %arg0, %c0_i32 : i32, i32
  }
}

</mosaic_0001>

<bundles_post_ra>
// kernel: tpu_custom_call.1
= control target key start
LH: loop header
LB: loop body
LE: loop exit
PB: predicated region body
PF: predicated region fallthrough
CT: control target
= control target key end

     0   :  { %14 = vsyncpa [#allocation3], 0  ;;  %s4552_s0 = inlined_call_operand.vmem [shape: bf16[64,32], index: 0, kind: input, shape index: {}]   ;;  %s4553_s1 = inlined_call_operand.hbm [shape: bf16[32,512], index: 1, kind: input, shape index: {}]   ;;  %s4554_s2 = inlined_call_operand.vmem [shape: f32[1,512], index: 2, kind: input, shape index: {}]   ;;  %s4555_s3 = inlined_call_operand.hbm [shape: bf16[512,512], index: 3, kind: input, shape index: {}]   ;;  %s4556_s4 = inlined_call_operand.vmem [shape: f32[1,512], index: 4, kind: input, shape index: {}]   ;;  %s4557_s5 = inlined_call_operand.hbm [shape: bf16[512,512], index: 5, kind: input, shape index: {}]   ;;  %s4558_s6 = inlined_call_operand.vmem [shape: f32[1,512], index: 6, kind: input, shape index: {}]   ;;  %s4559_s7 = inlined_call_operand.hbm [shape: bf16[512,128], index: 7, kind: input, shape index: {}]   ;;  %s4560_s8 = inlined_call_operand.vmem [shape: f32[1,128], index: 8, kind: input, shape index: {}]   ;;  %s4561_s9 = inlined_call_operand.hbm [shape: f32[64,128], index: 9, kind: output, shape index: {}]  }
   0x1   :  { %15 = vsyncpa [#allocation6], 0 }
   0x2   :  { %16 = vsyncpa [#allocation9], 0 }
   0x3   :  { %17 = vsyncpa [#allocation4], 0  ;;  %s4153_s30 = smov [#allocation5]   ;;  %s4154_s11 = smov [#allocation2]  }
   0x4   :  { %s39_s10 = sshll.u32 %s4153_s30, 4  ;;  %s25_s12 = sshll.u32 %s4154_s11, 4  ;;  %s40_s10 = int_to_ptr.vmem [resolvable:$true] %s39_s10  ;;  %s4215_s12 = int_to_ptr.vmem [resolvable:$true] %s25_s12 }
   0x5   :  { %s4035_s15 = scalar_lea.hbm %s4555_s3, 16384 }
   0x6   :  { %p4036_p0 = scmp.ne.s32.totalorder %s4555_s3, %s4035_s15  ;;  %p4039_p1 = scmp.lt.u32.totalorder %s4035_s15, %s4555_s3 }
   0x8   :  { %p4041_p2 = pnand %p4039_p1, %p4036_p0 }
   0xa   :  { %4044 = shalt.err (!%p4041_p2)
}
   0xb   :  { %s4045_s20 = scalar_lea.vmem %s40_s10, 16384  ;;  %p4050_p4 = scmp.lt.s32.totalorder %s40_s10, %s40_s10 }
   0xc   :  { %p4046_p3 = scmp.ne.s32.totalorder %s40_s10, %s4045_s20  ;;  %p4051_p5 = scmp.lt.s32.totalorder %s4045_s20, %s4045_s20 }
   0xe   :  { %p4052_p6 = por %p4051_p5, %p4050_p4 }
  0x10   :  { %p4053_p7 = pnand %p4052_p6, %p4046_p3 }
  0x12   :  { %4056 = shalt.err (!%p4053_p7)
}
  0x13   :  { %s4155_s21 = smov 256   ;;  %s4156_s22 = smov 16  }
  0x14   :  { %45 = dma.hbm_to_vmem [thread:$0]  %s4555_s3, 16384, %s40_s10, [#allocation6], %s4155_s21, %s4155_s21, %s4156_s22  }
  0x15   :  { %s4057_s27 = scalar_lea.hbm %s4553_s1, 1024 }
  0x16   :  { %p4058_p8 = scmp.ne.s32.totalorder %s4553_s1, %s4057_s27  ;;  %p4061_p9 = scmp.lt.u32.totalorder %s4057_s27, %s4553_s1 }
  0x18   :  { %p4063_p10 = pnand %p4061_p9, %p4058_p8 }
  0x1a   :  { %4066 = shalt.err (!%p4063_p10)
}
  0x1b   :  { %s4067_s13 = scalar_lea.vmem %s4215_s12, 1024  ;;  %p4072_p12 = scmp.lt.s32.totalorder %s4215_s12, %s4215_s12 }
  0x1c   :  { %p4068_p11 = scmp.ne.s32.totalorder %s4215_s12, %s4067_s13  ;;  %p4073_p13 = scmp.lt.s32.totalorder %s4067_s13, %s4067_s13 }
  0x1e   :  { %p4074_p0 = por %p4073_p13, %p4072_p12 }
  0x20   :  { %p4075_p1 = pnand %p4074_p0, %p4068_p11 }
  0x22   :  { %4078 = shalt.err (!%p4075_p1)
}
  0x23   :  { %31 = dma.hbm_to_vmem [thread:$0]  %s4553_s1, 1024, %s4215_s12, [#allocation3], %s4155_s21, %s4155_s21, %s4156_s22  }
  0x24   :  { %s4157_s14 = smov [#allocation7]   ;;  %s4158_s16 = smov [#allocation8]  }
  0x25   :  { %s53_s15 = sshll.u32 %s4157_s14, 4  ;;  %s67_s17 = sshll.u32 %s4158_s16, 4  ;;  %s54_s15 = int_to_ptr.vmem [resolvable:$true] %s53_s15  ;;  %s4252_s17 = int_to_ptr.vmem [resolvable:$true] %s67_s17 }
  0x26   :  { %s4079_s20 = scalar_lea.hbm %s4557_s5, 16384 }
  0x27   :  { %p4080_p2 = scmp.ne.s32.totalorder %s4557_s5, %s4079_s20  ;;  %p4083_p3 = scmp.lt.u32.totalorder %s4079_s20, %s4557_s5 }
  0x29   :  { %p4085_p4 = pnand %p4083_p3, %p4080_p2 }
  0x2b   :  { %4088 = shalt.err (!%p4085_p4)
}
  0x2c   :  { %s4089_s1 = scalar_lea.vmem %s54_s15, 16384  ;;  %p4094_p6 = scmp.lt.s32.totalorder %s54_s15, %s54_s15 }
  0x2d   :  { %p4090_p5 = scmp.ne.s32.totalorder %s54_s15, %s4089_s1  ;;  %p4095_p7 = scmp.lt.s32.totalorder %s4089_s1, %s4089_s1 }
  0x2f   :  { %p4096_p8 = por %p4095_p7, %p4094_p6 }
  0x31   :  { %p4097_p9 = pnand %p4096_p8, %p4090_p5 }
  0x33   :  { %4100 = shalt.err (!%p4097_p9)
}
  0x34   :  { %59 = dma.hbm_to_vmem [thread:$0]  %s4557_s5, 16384, %s54_s15, [#allocation6], %s4155_s21, %s4155_s21, %s4156_s22  }
  0x35   :  { %s4101_s30 = scalar_lea.hbm %s4559_s7, 4096 }
  0x36   :  { %p4102_p10 = scmp.ne.s32.totalorder %s4559_s7, %s4101_s30  ;;  %p4105_p11 = scmp.lt.u32.totalorder %s4101_s30, %s4559_s7 }
  0x38   :  { %p4107_p12 = pnand %p4105_p11, %p4102_p10 }
  0x3a   :  { %4110 = shalt.err (!%p4107_p12)
}
  0x3b   :  { %s4111_s14 = scalar_lea.vmem %s4252_s17, 4096  ;;  %p4116_p0 = scmp.lt.s32.totalorder %s4252_s17, %s4252_s17 }
  0x3c   :  { %p4112_p13 = scmp.ne.s32.totalorder %s4252_s17, %s4111_s14  ;;  %p4117_p1 = scmp.lt.s32.totalorder %s4111_s14, %s4111_s14 }
  0x3e   :  { %p4118_p2 = por %p4117_p1, %p4116_p0 }
  0x40   :  { %p4119_p3 = pnand %p4118_p2, %p4112_p13 }
  0x42   :  { %4122 = shalt.err (!%p4119_p3)
}
  0x43   :  { %s4159_s5 = smov 64   ;;  %s4160_s21 = smov 4  }
  0x44   :  { %73 = dma.hbm_to_vmem [thread:$0]  %s4559_s7, 4096, %s4252_s17, [#allocation9], %s4159_s5, %s4159_s5, %s4160_s21  }
  0x45   :  { %4145 = dma.done.wait [#allocation3], 1024  }
  0x46   :  { %4146 = vsyncadd [#allocation3], 4294966272 }
  0x47   :  { %4147 = dma.done.wait [#allocation6], 32768  }
  0x48   :  { %4148 = vsyncadd [#allocation6], 4294934528 }
  0x49   :  { %4149 = dma.done.wait [#allocation9], 4096  }
  0x4a   :  { %4150 = vsyncadd [#allocation9], 4294963200  ;;  %v4161_v0 = vmov 0   ;;  %v3603_v1 = vld [vmem:[#allocation2 + $0x4] ss:$16 sps:$4 sm:$0xff]   ;;  %vm187_vm0 = vcmask 261120  }
  0x4b   :  { %232 = vmatprep.mubr.bf16.mxu0 %v4161_v0  ;;  %305 = vmatprep.mubr.bf16.mxu1 %v4161_v0  ;;  %v3605_v2 = vld [vmem:[#allocation2] ss:$16 sps:$4 sm:$0xff]   ;;  %v3606_v3 = vld [vmem:[#allocation2 + $0x24] ss:$16 sps:$4 sm:$0xff]   ;;  %v3613_v6 = vld [vmem:[#allocation2 + $0xc] ss:$16 sps:$4 sm:$0xff]  }
  0x4c   :  { %200 = vmatprep.subr.bf16.mxu0 %v3603_v1  ;;  %v3608_v4 = vld [vmem:[#allocation2 + $0x20] ss:$16 sps:$4 sm:$0xff]   ;;  %v3615_v7 = vld [vmem:[#allocation2 + $0x8] ss:$16 sps:$4 sm:$0xff]   ;;  %v3616_v8 = vld [vmem:[#allocation2 + $0x2c] ss:$16 sps:$4 sm:$0xff]   ;;  %273 = vmatprep.subr.bf16.mxu1 %v3613_v6 }
  0x4d   :  { %201 = vmatpush1.bf16.msra.mxu0 %v3605_v2  ;;  %v3609_v5 = vld [vmem:[%s4552_s0] sm:$0xff]   ;;  %v3618_v9 = vld [vmem:[#allocation2 + $0x28] ss:$16 sps:$4 sm:$0xff]   ;;  %274 = vmatpush1.bf16.msra.mxu1 %v3615_v7  ;;  %v3624_v12 = vld [vmem:[#allocation5 + $0xc] ss:$16 sps:$4 sm:$0xff]  }
  0x4e   :  { %202 = vmatprep.subr.bf16.mxu0 %v3606_v3  ;;  %v3619_v10 = vld [vmem:[#allocation5] ss:$16 sps:$4 sm:$0xff]   ;;  %v3621_v11 = vld [vmem:[#allocation5 + $0x4] ss:$16 sps:$4 sm:$0xff]   ;;  %275 = vmatprep.subr.bf16.mxu1 %v3616_v8  ;;  %v3610_v15 = vld [vmem:[%s4552_s0 + $0x8] sm:$0xff]  }
  0x4f   :  { %v3625_v13 = vld [vmem:[#allocation5 + $0x20] ss:$16 sps:$4 sm:$0xff]   ;;  %v3627_v14 = vld [vmem:[#allocation5 + $0x24] ss:$16 sps:$4 sm:$0xff]   ;;  %v3622_v16 = vld [vmem:[#allocation5 + $0x8] ss:$16 sps:$4 sm:$0xff]  }
  0x50   :  { %v3630_v17 = vld [vmem:[#allocation5 + $0x2c] ss:$16 sps:$4 sm:$0xff]   ;;  %v3633_v18 = vld [vmem:[#allocation5 + $0x44] ss:$16 sps:$4 sm:$0xff]   ;;  %v3631_v19 = vld [vmem:[#allocation5 + $0x40] ss:$16 sps:$4 sm:$0xff]  }
  0x51   :  { %203 = vmatpush1.bf16.msra.mxu0 %v3608_v4  ;;  %276 = vmatpush1.bf16.msra.mxu1 %v3618_v9  ;;  %v3639_v20 = vld [vmem:[#allocation5 + $0x64] ss:$16 sps:$4 sm:$0xff]   ;;  %v3628_v21 = vld [vmem:[#allocation5 + $0x28] ss:$16 sps:$4 sm:$0xff]   ;;  %v3636_v22 = vld [vmem:[#allocation5 + $0x4c] ss:$16 sps:$4 sm:$0xff]  }
  0x52   :  { %1184 = vmatprep.subr.bf16.mxu0 %v3621_v11  ;;  %1330 = vmatprep.subr.bf16.mxu1 %v3624_v12  ;;  %v3637_v23 = vld [vmem:[#allocation5 + $0x60] ss:$16 sps:$4 sm:$0xff]   ;;  %v3634_v25 = vld [vmem:[#allocation5 + $0x48] ss:$16 sps:$4 sm:$0xff]   ;;  %v3642_v26 = vld [vmem:[#allocation5 + $0x6c] ss:$16 sps:$4 sm:$0xff]  }
  0x53   :  { %v3611_v24 = vld [vmem:[%s4552_s0 + $0x10] sm:$0xff]   ;;  %v3640_v30 = vld [vmem:[#allocation5 + $0x68] ss:$16 sps:$4 sm:$0xff]   ;;  %v3648_v31 = vld [vmem:[#allocation5 + $0x8c] ss:$16 sps:$4 sm:$0xff]  }
  0x54   :  { %3086 = vmatmul.mubr.msk.bf16.vlgmr.msra.gmra.mrb[0].mxu0 %vm187_vm0, %v3609_v5  ;;  %3090 = vmatmul.mubr.msk.bf16.vlgmr.msra.gmra.mrb[0].mxu1 %vm187_vm0, %v3609_v5  ;;  %v3645_v27 = vld [vmem:[#allocation5 + $0x84] ss:$16 sps:$4 sm:$0xff]   ;;  %v3643_v28 = vld [vmem:[#allocation5 + $0x80] ss:$16 sps:$4 sm:$0xff]   ;;  %v3612_v33 = vld [vmem:[%s4552_s0 + $0x18] sm:$0xff]  }
  0x55   :  { %242 = vmatprep.mubr.bf16.mxu0 %v4161_v0  ;;  %1185 = vmatpush1.bf16.msra.mxu0 %v3619_v10  ;;  %v3651_v29 = vld [vmem:[#allocation5 + $0xa4] ss:$16 sps:$4 sm:$0xff]   ;;  %v3649_v32 = vld [vmem:[#allocation5 + $0xa0] ss:$16 sps:$4 sm:$0xff]   ;;  %v3646_v34 = vld [vmem:[#allocation5 + $0x88] ss:$16 sps:$4 sm:$0xff]  }
  0x56   :  { %1186 = vmatprep.subr.bf16.mxu0 %v3627_v14  ;;  %315 = vmatprep.mubr.bf16.mxu1 %v4161_v0  ;;  %v3657_v35 = vld [vmem:[#allocation5 + $0xc4] ss:$16 sps:$4 sm:$0xff]   ;;  %v3654_v36 = vld [vmem:[#allocation5 + $0xac] ss:$16 sps:$4 sm:$0xff]   ;;  %v3655_v37 = vld [vmem:[#allocation5 + $0xc0] ss:$16 sps:$4 sm:$0xff]  }
  0x57   :  { %1331 = vmatpush1.bf16.msra.mxu1 %v3622_v16  ;;  %v3663_v38 = vld [vmem:[#allocation5 + $0xe4] ss:$16 sps:$4 sm:$0xff]   ;;  %v3652_v39 = vld [vmem:[#allocation5 + $0xa8] ss:$16 sps:$4 sm:$0xff]   ;;  %v3660_v40 = vld [vmem:[#allocation5 + $0xcc] ss:$16 sps:$4 sm:$0xff]  }
  0x58   :  { %1332 = vmatprep.subr.bf16.mxu1 %v3630_v17  ;;  %v3661_v41 = vld [vmem:[#allocation5 + $0xe0] ss:$16 sps:$4 sm:$0xff]   ;;  %v3669_v42 = vld [vmem:[#allocation5 + $0x104] ss:$16 sps:$4 sm:$0xff]   ;;  %v3658_v43 = vld [vmem:[#allocation5 + $0xc8] ss:$16 sps:$4 sm:$0xff]  }
  0x59   :  { %1187 = vmatpush1.bf16.msra.mxu0 %v3625_v13  ;;  %v3666_v44 = vld [vmem:[#allocation5 + $0xec] ss:$16 sps:$4 sm:$0xff]   ;;  %v3667_v45 = vld [vmem:[#allocation5 + $0x100] ss:$16 sps:$4 sm:$0xff]   ;;  %v3675_v46 = vld [vmem:[#allocation5 + $0x124] ss:$16 sps:$4 sm:$0xff]  }
  0x5a   :  { %1188 = vmatprep.subr.bf16.mxu0 %v3633_v18  ;;  %v3664_v47 = vld [vmem:[#allocation5 + $0xe8] ss:$16 sps:$4 sm:$0xff]   ;;  %v3672_v48 = vld [vmem:[#allocation5 + $0x10c] ss:$16 sps:$4 sm:$0xff]   ;;  %v3673_v49 = vld [vmem:[#allocation5 + $0x120] ss:$16 sps:$4 sm:$0xff]  }
  0x5b   :  { %1333 = vmatpush1.bf16.msra.mxu1 %v3628_v21  ;;  %v3670_v50 = vld [vmem:[#allocation5 + $0x108] ss:$16 sps:$4 sm:$0xff]   ;;  %v3678_v51 = vld [vmem:[#allocation5 + $0x12c] ss:$16 sps:$4 sm:$0xff]   ;;  %v3681_v52 = vld [vmem:[#allocation5 + $0x144] ss:$16 sps:$4 sm:$0xff]  }
  0x5c   :  { %3087 = vmatmul.mubr.msk.bf16.gmra.mrb[4].mxu0 %vm187_vm0, %v3610_v15  ;;  %1334 = vmatprep.subr.bf16.mxu1 %v3636_v22  ;;  %v3679_v53 = vld [vmem:[#allocation5 + $0x140] ss:$16 sps:$4 sm:$0xff]   ;;  %v3687_v54 = vld [vmem:[#allocation5 + $0x164] ss:$16 sps:$4 sm:$0xff]   ;;  %v3676_v55 = vld [vmem:[#allocation5 + $0x128] ss:$16 sps:$4 sm:$0xff]  }
  0x5d   :  { %252 = vmatprep.mubr.bf16.mxu0 %v4161_v0  ;;  %1189 = vmatpush1.bf16.msra.mxu0 %v3631_v19  ;;  %v3684_v56 = vld [vmem:[#allocation5 + $0x14c] ss:$16 sps:$4 sm:$0xff]   ;;  %v3685_v57 = vld [vmem:[#allocation5 + $0x160] ss:$16 sps:$4 sm:$0xff]   ;;  %v3693_v58 = vld [vmem:[#allocation5 + $0x184] ss:$16 sps:$4 sm:$0xff]  }
  0x5e   :  { %1190 = vmatprep.subr.bf16.mxu0 %v3639_v20  ;;  %3091 = vmatmul.mubr.msk.bf16.gmra.mrb[4].mxu1 %vm187_vm0, %v3610_v15  ;;  %v3682_v59 = vld [vmem:[#allocation5 + $0x148] ss:$16 sps:$4 sm:$0xff]   ;;  %v3690_v60 = vld [vmem:[#allocation5 + $0x16c] ss:$16 sps:$4 sm:$0xff]   ;;  %v3691_v61 = vld [vmem:[#allocation5 + $0x180] ss:$16 sps:$4 sm:$0xff]   ;;  %v107_v15 = vlaneseq }
  0x5f   :  { %325 = vmatprep.mubr.bf16.mxu1 %v4161_v0  ;;  %1335 = vmatpush1.bf16.msra.mxu1 %v3634_v25  ;;  %v3699_v62 = vld [vmem:[#allocation5 + $0x1a4] ss:$16 sps:$4 sm:$0xff]   ;;  %v3688_v63 = vld [vmem:[#allocation5 + $0x168] ss:$16 sps:$4 sm:$0xff]   ;;  %v3697_v1 = vld [vmem:[#allocation5 + $0x1a0] ss:$16 sps:$4 sm:$0xff]  }
  0x60   :  { %1336 = vmatprep.subr.bf16.mxu1 %v3642_v26  ;;  %v3694_v2 = vld [vmem:[#allocation5 + $0x188] ss:$16 sps:$4 sm:$0xff]   ;;  %v3702_v3 = vld [vmem:[#allocation5 + $0x1ac] ss:$16 sps:$4 sm:$0xff]   ;;  %v3705_v5 = vld [vmem:[#allocation5 + $0x1c4] ss:$16 sps:$4 sm:$0xff]  }
  0x61   :  { %1191 = vmatpush1.bf16.msra.mxu0 %v3637_v23  ;;  %v3700_v4 = vld [vmem:[#allocation5 + $0x1a8] ss:$16 sps:$4 sm:$0xff]   ;;  %v3708_v6 = vld [vmem:[#allocation5 + $0x1cc] ss:$16 sps:$4 sm:$0xff]   ;;  %v3703_v7 = vld [vmem:[#allocation5 + $0x1c0] ss:$16 sps:$4 sm:$0xff]  }
  0x62   :  { %1192 = vmatprep.subr.bf16.mxu0 %v3645_v27  ;;  %v3706_v8 = vld [vmem:[#allocation5 + $0x1c8] ss:$16 sps:$4 sm:$0xff]   ;;  %v3711_v9 = vld [vmem:[#allocation5 + $0x1e4] ss:$16 sps:$4 sm:$0xff]   ;;  %v3714_v10 = vld [vmem:[#allocation5 + $0x1ec] ss:$16 sps:$4 sm:$0xff]  }
  0x63   :  { %1337 = vmatpush1.bf16.msra.mxu1 %v3640_v30  ;;  %v3709_v11 = vld [vmem:[#allocation5 + $0x1e0] ss:$16 sps:$4 sm:$0xff]   ;;  %v3712_v12 = vld [vmem:[#allocation5 + $0x1e8] ss:$16 sps:$4 sm:$0xff]   ;;  %v3717_v13 = vld [vmem:[#allocation5 + $0x204] ss:$16 sps:$4 sm:$0xff]  }
  0x64   :  { %3088 = vmatmul.mubr.msk.bf16.gmra.mrb[8].mxu0 %vm187_vm0, %v3611_v24  ;;  %1338 = vmatprep.subr.bf16.mxu1 %v3648_v31  ;;  %v3720_v14 = vld [vmem:[#allocation5 + $0x20c] ss:$16 sps:$4 sm:$0xff]   ;;  %v108_v16 = vshrl.u32 %v107_v15, 7  ;;  %v105_v18 = vld [vmem:[%s4554_s2] sm:$0xf] }
  0x65   :  { %262 = vmatprep.mubr.bf16.mxu0 %v4161_v0  ;;  %1193 = vmatpush1.bf16.msra.mxu0 %v3643_v28 }
  0x66   :  { %1194 = vmatprep.subr.bf16.mxu0 %v3651_v29  ;;  %3092 = vmatmul.mubr.msk.bf16.gmra.mrb[8].mxu1 %vm187_vm0, %v3611_v24  ;;  %v4314_v17 = vsub.s32 0, %v108_v16  ;;  %v4319_v19 = vsub.s32 1, %v108_v16  ;;  %v4327_v23 = vsub.s32 2, %v108_v16  ;;  %v4330_v26 = vsub.s32 3, %v108_v16 }
  0x67   :  { %335 = vmatprep.mubr.bf16.mxu1 %v4161_v0  ;;  %1339 = vmatpush1.bf16.msra.mxu1 %v3646_v34  ;;  %v3696_v0 = vld [vmem:[#allocation5 + $0x18c] ss:$16 sps:$4 sm:$0xff]  }
  0x68   :  { %1340 = vmatprep.subr.bf16.mxu1 %v3654_v36  ;;  %v4322_v20 = vrot.slane %v105_v18, %v4314_v17  ;;  %v4325_v21 = vrot.slane %v105_v18, %v4319_v19 }
  0x69   :  { %1195 = vmatpush1.bf16.msra.mxu0 %v3649_v32  ;;  %v4336_v32 = vrot.slane %v105_v18, %v4327_v23 }
  0x6a   :  { %1196 = vmatprep.subr.bf16.mxu0 %v3657_v35  ;;  %v4339_v35 = vrot.slane %v105_v18, %v4330_v26 }
  0x6b   :  { %1341 = vmatpush1.bf16.msra.mxu1 %v3652_v39 }
  0x6c   :  { %3089 = vmatmul.mubr.msk.bf16.gmra.mrb[12].mxu0 %vm187_vm0, %v3612_v33  ;;  %1342 = vmatprep.subr.bf16.mxu1 %v3660_v40 }
  0x6d   :  { %1197 = vmatpush1.bf16.msra.mxu0 %v3655_v37 }
  0x6e   :  { %1198 = vmatprep.subr.bf16.mxu0 %v3663_v38  ;;  %3093 = vmatmul.mubr.msk.bf16.gmra.mrb[12].mxu1 %vm187_vm0, %v3612_v33 }
  0x6f   :  { %1343 = vmatpush1.bf16.msra.mxu1 %v3658_v43 }
  0x70   :  { %1344 = vmatprep.subr.bf16.mxu1 %v3666_v44 }
  0x71   :  { %1199 = vmatpush1.bf16.msra.mxu0 %v3661_v41  ;;  %v3715_v41 = vld [vmem:[#allocation5 + $0x200] ss:$16 sps:$4 sm:$0xff]  }
  0x72   :  { %1200 = vmatprep.subr.bf16.mxu0 %v3669_v42  ;;  %v3718_v42 = vld [vmem:[#allocation5 + $0x208] ss:$16 sps:$4 sm:$0xff]  }
  0x73   :  { %1345 = vmatpush1.bf16.msra.mxu1 %v3664_v47  ;;  %v3726_v47 = vld [vmem:[#allocation5 + $0x22c] ss:$16 sps:$4 sm:$0xff]  }
  0x74   :  { %1346 = vmatprep.subr.bf16.mxu1 %v3672_v48 }
  0x75   :  { %1201 = vmatpush1.bf16.msra.mxu0 %v3667_v45 }
  0x76   :  { %1202 = vmatprep.subr.bf16.mxu0 %v3675_v46  ;;  %v3723_v46 = vld [vmem:[#allocation5 + $0x224] ss:$16 sps:$4 sm:$0xff]  }
  0x77   :  { %1347 = vmatpush1.bf16.msra.mxu1 %v3670_v50 }
  0x78   :  { %1348 = vmatprep.subr.bf16.mxu1 %v3678_v51 }
  0x79   :  { %1203 = vmatpush1.bf16.msra.mxu0 %v3673_v49 }
  0x7a   :  { %1204 = vmatprep.subr.bf16.mxu0 %v3681_v52 }
  0x7b   :  { %1349 = vmatpush1.bf16.msra.mxu1 %v3676_v55 }
  0x7c   :  { %1350 = vmatprep.subr.bf16.mxu1 %v3684_v56 }
  0x7d   :  { %1205 = vmatpush1.bf16.msra.mxu0 %v3679_v53 }
  0x7e   :  { %1206 = vmatprep.subr.bf16.mxu0 %v3687_v54 }
  0x7f   :  { %1351 = vmatpush1.bf16.msra.mxu1 %v3682_v59 }
  0x80   :  { %1352 = vmatprep.subr.bf16.mxu1 %v3690_v60 }
  0x81   :  { %1207 = vmatpush1.bf16.msra.mxu0 %v3685_v57 }
  0x82   :  { %1208 = vmatprep.subr.bf16.mxu0 %v3693_v58 }
  0x83   :  { %1353 = vmatpush1.bf16.msra.mxu1 %v3688_v63  ;;  %v3724_v63 = vld [vmem:[#allocation5 + $0x228] ss:$16 sps:$4 sm:$0xff]  }
  0x84   :  { %1354 = vmatprep.subr.bf16.mxu1 %v3696_v0 }
  0x85   :  { %1209 = vmatpush1.bf16.msra.mxu0 %v3691_v61 }
  0x86   :  { %1210 = vmatprep.subr.bf16.mxu0 %v3699_v62  ;;  %v3721_v62 = vld [vmem:[#allocation5 + $0x220] ss:$16 sps:$4 sm:$0xff]  }
  0x87   :  { %1355 = vmatpush1.bf16.msra.mxu1 %v3694_v2 }
  0x88   :  { %1356 = vmatprep.subr.bf16.mxu1 %v3702_v3  ;;  %v3729_v3 = vld [vmem:[#allocation5 + $0x244] ss:$16 sps:$4 sm:$0xff]  }
  0x89   :  { %1211 = vmatpush1.bf16.msra.mxu0 %v3697_v1 }
  0x8a   :  { %1212 = vmatprep.subr.bf16.mxu0 %v3705_v5 }
  0x8b   :  { %1357 = vmatpush1.bf16.msra.mxu1 %v3700_v4  ;;  %v3732_v4 = vld [vmem:[#allocation5 + $0x24c] ss:$16 sps:$4 sm:$0xff]  }
  0x8c   :  { %1358 = vmatprep.subr.bf16.mxu1 %v3708_v6 }
  0x8d   :  { %1213 = vmatpush1.bf16.msra.mxu0 %v3703_v7 }
  0x8e   :  { %1214 = vmatprep.subr.bf16.mxu0 %v3711_v9 }
  0x8f   :  { %1359 = vmatpush1.bf16.msra.mxu1 %v3706_v8 }
  0x90   :  { %1360 = vmatprep.subr.bf16.mxu1 %v3714_v10 }
  0x91   :  { %1215 = vmatpush1.bf16.msra.mxu0 %v3709_v11 }
  0x92   :  { %1257 = vmatprep.subr.bf16.mxu0 %v3717_v13  ;;  %v3730_v13 = vld [vmem:[#allocation5 + $0x248] ss:$16 sps:$4 sm:$0xff]  }
  0x93   :  { %1361 = vmatpush1.bf16.msra.mxu1 %v3712_v12  ;;  %v3727_v12 = vld [vmem:[#allocation5 + $0x240] ss:$16 sps:$4 sm:$0xff]  }
  0x94   :  { %1403 = vmatprep.subr.bf16.mxu1 %v3720_v14 }
 0x127   :  { %v234_v22 = vpop.f32.mrb[0].mxu0  ;;  %v307_v39 = vpop.f32.mrb[0].mxu1 }
 0x128   :  { %v235_v24 = vadd.f32 %v234_v22, %v4322_v20  ;;  %v236_v25 = vpop.f32.mrb[1].mxu0  ;;  %v308_v44 = vadd.f32 %v307_v39, %v4336_v32  ;;  %v309_v45 = vpop.f32.mrb[1].mxu1  ;;  %v3735_v22 = vld [vmem:[#allocation5 + $0x264] ss:$16 sps:$4 sm:$0xff]  }
 0x129   :  { %v237_v27 = vadd.f32 %v236_v25, %v4325_v21  ;;  %v238_v28 = vpop.f32.mrb[2].mxu0  ;;  %v310_v50 = vadd.f32 %v309_v45, %v4339_v35  ;;  %v311_v51 = vpop.f32.mrb[2].mxu1 }
 0x12a   :  { %v239_v29 = vadd.f32 %v238_v28, %v4322_v20  ;;  %v240_v30 = vpop.f32.mrb[3].mxu0  ;;  %v346_v33 = vmax.f32 %v235_v24, 0.0  ;;  %v348_v54 = vmax.f32 %v308_v44, 0.0  ;;  %v312_v55 = vadd.f32 %v311_v51, %v4336_v32  ;;  %v313_v56 = vpop.f32.mrb[3].mxu1  ;;  %v3738_v24 = vld [vmem:[#allocation5 + $0x26c] ss:$16 sps:$4 sm:$0xff]  }
 0x12b   :  { %v241_v31 = vadd.f32 %v240_v30, %v4325_v21  ;;  %v347_v36 = vmax.f32 %v237_v27, 0.0  ;;  %v349_v60 = vmax.f32 %v310_v50, 0.0  ;;  %v314_v61 = vadd.f32 %v313_v56, %v4339_v35  ;;  %v3739_v56 = vld [vmem:[#allocation5 + $0x280] ss:$16 sps:$4 sm:$0xff]  }
 0x12c   :  { %v350_v34 = vmax.f32 %v239_v29, 0.0  ;;  %v352_v2 = vmax.f32 %v312_v55, 0.0 }
 0x12d   :  { %v351_v37 = vmax.f32 %v241_v31, 0.0  ;;  %v353_v6 = vmax.f32 %v314_v61, 0.0 }
 0x12e   :  { %v378_v38 = vpack.c.bf16 %v350_v34, %v346_v33  ;;  %v4349_v8 = vpack.c.bf16 %v352_v2, %v348_v54 }
 0x12f   :  { %v379_v40 = vpack.c.bf16 %v351_v37, %v347_v36  ;;  %v244_v43 = vpop.f32.mrb[4].mxu0  ;;  %v4351_v10 = vpack.c.bf16 %v353_v6, %v349_v60 }
 0x130   :  { %v245_v48 = vadd.f32 %v244_v43, %v4322_v20  ;;  %v246_v49 = vpop.f32.mrb[5].mxu0  ;;  %v3736_v43 = vld [vmem:[#allocation5 + $0x268] ss:$16 sps:$4 sm:$0xff]  }
 0x131   :  { %1216 = vmatprep.mubr.bf16.mxu0 %v379_v40  ;;  %1362 = vmatprep.mubr.bf16.mxu1 %v379_v40  ;;  %v247_v52 = vadd.f32 %v246_v49, %v4325_v21  ;;  %v248_v53 = vpop.f32.mrb[6].mxu0  ;;  %v317_v11 = vpop.f32.mrb[4].mxu1 }
 0x132   :  { %1217 = vmatmul.mubr.bf16.vlgmr.msra.gmra.mrb[16].mxu0 %v378_v38  ;;  %1363 = vmatmul.mubr.bf16.vlgmr.msra.gmra.mrb[16].mxu1 %v378_v38  ;;  %v354_v57 = vmax.f32 %v245_v48, 0.0  ;;  %v249_v58 = vadd.f32 %v248_v53, %v4322_v20  ;;  %v250_v59 = vpop.f32.mrb[7].mxu0  ;;  %v318_v16 = vadd.f32 %v317_v11, %v4336_v32  ;;  %v319_v18 = vpop.f32.mrb[5].mxu1  ;;  %v3744_v48 = vld [vmem:[#allocation5 + $0x28c] ss:$16 sps:$4 sm:$0xff]  }
 0x133   :  { %1258 = vmatpush1.bf16.msra.mxu0 %v3715_v41  ;;  %1404 = vmatpush1.bf16.msra.mxu1 %v3718_v42  ;;  %v355_v0 = vmax.f32 %v247_v52, 0.0  ;;  %v251_v1 = vadd.f32 %v250_v59, %v4325_v21  ;;  %v320_v28 = vadd.f32 %v319_v18, %v4339_v35  ;;  %v321_v29 = vpop.f32.mrb[6].mxu1  ;;  %v3733_v42 = vld [vmem:[#allocation5 + $0x260] ss:$16 sps:$4 sm:$0xff]   ;;  %v3748_v18 = vld [vmem:[#allocation5 + $0x2a8] ss:$16 sps:$4 sm:$0xff]  }
 0x134   :  { %1259 = vmatprep.subr.bf16.mxu0 %v3723_v46  ;;  %1405 = vmatprep.subr.bf16.mxu1 %v3726_v47  ;;  %v358_v5 = vmax.f32 %v249_v58, 0.0  ;;  %v356_v33 = vmax.f32 %v318_v16, 0.0  ;;  %v322_v34 = vadd.f32 %v321_v29, %v4336_v32  ;;  %v323_v36 = vpop.f32.mrb[7].mxu1  ;;  %v3741_v47 = vld [vmem:[#allocation5 + $0x284] ss:$16 sps:$4 sm:$0xff]  }
 0x135   :  { %v359_v7 = vmax.f32 %v251_v1, 0.0  ;;  %v357_v40 = vmax.f32 %v320_v28, 0.0  ;;  %v324_v41 = vadd.f32 %v323_v36, %v4339_v35  ;;  %v3745_v16 = vld [vmem:[#allocation5 + $0x2a0] ss:$16 sps:$4 sm:$0xff]   ;;  %v3756_v28 = vld [vmem:[#allocation5 + $0x2cc] ss:$16 sps:$4 sm:$0xff]  }
 0x136   :  { %v382_v9 = vpack.c.bf16 %v358_v5, %v354_v57  ;;  %v360_v46 = vmax.f32 %v322_v34, 0.0  ;;  %v3742_v57 = vld [vmem:[#allocation5 + $0x288] ss:$16 sps:$4 sm:$0xff]  }
 0x137   :  { %1260 = vmatpush1.bf16.msra.mxu0 %v3721_v62  ;;  %1406 = vmatpush1.bf16.msra.mxu1 %v3724_v63  ;;  %v383_v14 = vpack.c.bf16 %v359_v7, %v355_v0  ;;  %v254_v15 = vpop.f32.mrb[8].mxu0  ;;  %v361_v50 = vmax.f32 %v324_v41, 0.0  ;;  %v3747_v62 = vld [vmem:[#allocation5 + $0x2a4] ss:$16 sps:$4 sm:$0xff]   ;;  %v3750_v63 = vld [vmem:[#allocation5 + $0x2ac] ss:$16 sps:$4 sm:$0xff]  }
 0x138   :  { %1261 = vmatprep.subr.bf16.mxu0 %v3729_v3  ;;  %1407 = vmatprep.subr.bf16.mxu1 %v3732_v4  ;;  %v255_v25 = vadd.f32 %v254_v15, %v4322_v20  ;;  %v256_v27 = vpop.f32.mrb[9].mxu0  ;;  %v4361_v52 = vpack.c.bf16 %v360_v46, %v356_v33  ;;  %v3759_v41 = vld [vmem:[#allocation5 + $0x2e4] ss:$16 sps:$4 sm:$0xff]  }
 0x139   :  { %v257_v30 = vadd.f32 %v256_v27, %v4325_v21  ;;  %v258_v31 = vpop.f32.mrb[10].mxu0  ;;  %1226 = vmatprep.mubr.bf16.mxu0 %v383_v14  ;;  %1372 = vmatprep.mubr.bf16.mxu1 %v383_v14  ;;  %v4363_v54 = vpack.c.bf16 %v361_v50, %v357_v40  ;;  %v327_v55 = vpop.f32.mrb[8].mxu1  ;;  %v3753_v27 = vld [vmem:[#allocation5 + $0x2c4] ss:$16 sps:$4 sm:$0xff]   ;;  %v3757_v50 = vld [vmem:[#allocation5 + $0x2e0] ss:$16 sps:$4 sm:$0xff]  }
 0x13a   :  { %v362_v37 = vmax.f32 %v255_v25, 0.0  ;;  %v259_v38 = vadd.f32 %v258_v31, %v4322_v20  ;;  %v260_v39 = vpop.f32.mrb[11].mxu0  ;;  %1227 = vmatmul.mubr.bf16.gmra.mrb[20].mxu0 %v382_v9  ;;  %1373 = vmatmul.mubr.bf16.gmra.mrb[20].mxu1 %v382_v9  ;;  %v328_v60 = vadd.f32 %v327_v55, %v4336_v32  ;;  %v329_v61 = vpop.f32.mrb[9].mxu1  ;;  %v3765_v55 = vld [vmem:[#allocation5 + $0x304] ss:$16 sps:$4 sm:$0xff]  }
 0x13b   :  { %1262 = vmatpush1.bf16.msra.mxu0 %v3727_v12  ;;  %1408 = vmatpush1.bf16.msra.mxu1 %v3730_v13  ;;  %v363_v44 = vmax.f32 %v257_v30, 0.0  ;;  %v261_v45 = vadd.f32 %v260_v39, %v4325_v21  ;;  %v330_v2 = vadd.f32 %v329_v61, %v4339_v35  ;;  %v331_v3 = vpop.f32.mrb[10].mxu1  ;;  %v3774_v61 = vld [vmem:[#allocation5 + $0x32c] ss:$16 sps:$4 sm:$0xff]  }
 0x13c   :  { %1263 = vmatprep.subr.bf16.mxu0 %v3735_v22  ;;  %1409 = vmatprep.subr.bf16.mxu1 %v3738_v24  ;;  %v366_v49 = vmax.f32 %v259_v38, 0.0  ;;  %v364_v6 = vmax.f32 %v328_v60, 0.0  ;;  %v332_v7 = vadd.f32 %v331_v3, %v4336_v32  ;;  %v333_v9 = vpop.f32.mrb[11].mxu1  ;;  %v3754_v38 = vld [vmem:[#allocation5 + $0x2c8] ss:$16 sps:$4 sm:$0xff]  }
 0x13d   :  { %v367_v51 = vmax.f32 %v261_v45, 0.0  ;;  %v365_v14 = vmax.f32 %v330_v2, 0.0  ;;  %v334_v15 = vadd.f32 %v333_v9, %v4339_v35  ;;  %v3771_v60 = vld [vmem:[#allocation5 + $0x324] ss:$16 sps:$4 sm:$0xff]   ;;  %v3778_v2 = vld [vmem:[#allocation5 + $0x348] ss:$16 sps:$4 sm:$0xff]  }
 0x13e   :  { %v386_v53 = vpack.c.bf16 %v366_v49, %v362_v37  ;;  %v368_v25 = vmax.f32 %v332_v7, 0.0  ;;  %v3751_v37 = vld [vmem:[#allocation5 + $0x2c0] ss:$16 sps:$4 sm:$0xff]   ;;  %v3783_v3 = vld [vmem:[#allocation5 + $0x364] ss:$16 sps:$4 sm:$0xff]  }
 0x13f   :  { %1264 = vmatpush1.bf16.msra.mxu0 %v3733_v42  ;;  %1410 = vmatpush1.bf16.msra.mxu1 %v3736_v43  ;;  %v387_v58 = vpack.c.bf16 %v367_v51, %v363_v44  ;;  %v264_v59 = vpop.f32.mrb[12].mxu0  ;;  %v3762_v42 = vld [vmem:[#allocation5 + $0x2ec] ss:$16 sps:$4 sm:$0xff]   ;;  %v3760_v51 = vld [vmem:[#allocation5 + $0x2e8] ss:$16 sps:$4 sm:$0xff]  }
 0x140   :  { %1265 = vmatprep.subr.bf16.mxu0 %v3741_v47  ;;  %1411 = vmatprep.subr.bf16.mxu1 %v3744_v48  ;;  %v265_v0 = vadd.f32 %v264_v59, %v4322_v20  ;;  %v266_v1 = vpop.f32.mrb[13].mxu0  ;;  %v4373_v31 = vpack.c.bf16 %v368_v25, %v364_v6  ;;  %v3766_v59 = vld [vmem:[#allocation5 + $0x308] ss:$16 sps:$4 sm:$0xff]   ;;  %v3789_v7 = vld [vmem:[#allocation5 + $0x384] ss:$16 sps:$4 sm:$0xff]  }
 0x141   :  { %v267_v4 = vadd.f32 %v266_v1, %v4325_v21  ;;  %v268_v5 = vpop.f32.mrb[14].mxu0  ;;  %1236 = vmatprep.mubr.bf16.mxu0 %v387_v58  ;;  %1382 = vmatprep.mubr.bf16.mxu1 %v387_v58  ;;  %v337_v36 = vpop.f32.mrb[12].mxu1  ;;  %v3775_v1 = vld [vmem:[#allocation5 + $0x340] ss:$16 sps:$4 sm:$0xff]   ;;  %v3784_v6 = vld [vmem:[#allocation5 + $0x368] ss:$16 sps:$4 sm:$0xff]  }
 0x142   :  { %v370_v11 = vmax.f32 %v265_v0, 0.0  ;;  %v269_v12 = vadd.f32 %v268_v5, %v4322_v20  ;;  %v270_v13 = vpop.f32.mrb[15].mxu0  ;;  %1237 = vmatmul.mubr.bf16.gmra.mrb[24].mxu0 %v386_v53  ;;  %1383 = vmatmul.mubr.bf16.gmra.mrb[24].mxu1 %v386_v53  ;;  %v369_v20 = vmax.f32 %v334_v15, 0.0  ;;  %v339_v40 = vpop.f32.mrb[13].mxu1  ;;  %v3777_v0 = vld [vmem:[#allocation5 + $0x344] ss:$16 sps:$4 sm:$0xff]  }
 0x143   :  { %1266 = vmatpush1.bf16.msra.mxu0 %v3739_v56  ;;  %1412 = vmatpush1.bf16.msra.mxu1 %v3742_v57  ;;  %v371_v22 = vmax.f32 %v267_v4, 0.0  ;;  %v271_v24 = vadd.f32 %v270_v13, %v4325_v21  ;;  %v338_v21 = vadd.f32 %v337_v36, %v4336_v32  ;;  %v340_v43 = vadd.f32 %v339_v40, %v4339_v35  ;;  %v341_v44 = vpop.f32.mrb[14].mxu1  ;;  %v3768_v56 = vld [vmem:[#allocation5 + $0x30c] ss:$16 sps:$4 sm:$0xff]   ;;  %v3781_v5 = vld [vmem:[#allocation5 + $0x360] ss:$16 sps:$4 sm:$0xff]  }
 0x144   :  { %1267 = vmatprep.subr.bf16.mxu0 %v3747_v62  ;;  %1413 = vmatprep.subr.bf16.mxu1 %v3750_v63  ;;  %v374_v29 = vmax.f32 %v269_v12, 0.0  ;;  %v4375_v34 = vpack.c.bf16 %v369_v20, %v365_v14  ;;  %v342_v46 = vadd.f32 %v341_v44, %v4336_v32  ;;  %v343_v47 = vpop.f32.mrb[15].mxu1  ;;  %v3769_v62 = vld [vmem:[#allocation5 + $0x320] ss:$16 sps:$4 sm:$0xff]   ;;  %v3772_v63 = vld [vmem:[#allocation5 + $0x328] ss:$16 sps:$4 sm:$0xff]  }
 0x145   :  { %v375_v30 = vmax.f32 %v271_v24, 0.0  ;;  %v372_v45 = vmax.f32 %v338_v21, 0.0  ;;  %v373_v48 = vmax.f32 %v340_v43, 0.0  ;;  %v344_v49 = vadd.f32 %v343_v47, %v4339_v35  ;;  %v3763_v35 = vld [vmem:[#allocation5 + $0x300] ss:$16 sps:$4 sm:$0xff]  }
 0x146   :  { %v390_v33 = vpack.c.bf16 %v374_v29, %v370_v11  ;;  %v376_v53 = vmax.f32 %v342_v46, 0.0  ;;  %v3786_v4 = vld [vmem:[#allocation5 + $0x36c] ss:$16 sps:$4 sm:$0xff]   ;;  %v3787_v11 = vld [vmem:[#allocation5 + $0x380] ss:$16 sps:$4 sm:$0xff]  }
 0x147   :  { %1268 = vmatpush1.bf16.msra.mxu0 %v3745_v16  ;;  %1414 = vmatpush1.bf16.msra.mxu1 %v3748_v18  ;;  %v391_v39 = vpack.c.bf16 %v375_v30, %v371_v22  ;;  %v377_v57 = vmax.f32 %v344_v49, 0.0  ;;  %v3792_v9 = vld [vmem:[#allocation5 + $0x38c] ss:$16 sps:$4 sm:$0xff]   ;;  %v3790_v12 = vld [vmem:[#allocation5 + $0x388] ss:$16 sps:$4 sm:$0xff]  }
 0x148   :  { %1269 = vmatprep.subr.bf16.mxu0 %v3753_v27  ;;  %1415 = vmatprep.subr.bf16.mxu1 %v3756_v28  ;;  %v4383_v32 = vpack.c.bf16 %v376_v53, %v372_v45  ;;  %v3795_v13 = vld [vmem:[#allocation5 + $0x3a4] ss:$16 sps:$4 sm:$0xff]   ;;  %v3798_v14 = vld [vmem:[#allocation5 + $0x3ac] ss:$16 sps:$4 sm:$0xff]   ;;  %v3793_v15 = vld [vmem:[#allocation5 + $0x3a0] ss:$16 sps:$4 sm:$0xff]  }
 0x149   :  { %1246 = vmatprep.mubr.bf16.mxu0 %v391_v39  ;;  %1392 = vmatprep.mubr.bf16.mxu1 %v391_v39  ;;  %v4385_v58 = vpack.c.bf16 %v377_v57, %v373_v48  ;;  %v3796_v16 = vld [vmem:[#allocation5 + $0x3a8] ss:$16 sps:$4 sm:$0xff]   ;;  %v3801_v18 = vld [vmem:[#allocation5 + $0x3c4] ss:$16 sps:$4 sm:$0xff]   ;;  %v3804_v22 = vld [vmem:[#allocation5 + $0x3cc] ss:$16 sps:$4 sm:$0xff]  }
 0x14a   :  { %1247 = vmatmul.mubr.bf16.gmra.mrb[28].mxu0 %v390_v33  ;;  %1393 = vmatmul.mubr.bf16.gmra.mrb[28].mxu1 %v390_v33  ;;  %v3799_v24 = vld [vmem:[#allocation5 + $0x3c0] ss:$16 sps:$4 sm:$0xff]   ;;  %v3802_v25 = vld [vmem:[#allocation5 + $0x3c8] ss:$16 sps:$4 sm:$0xff]   ;;  %v3807_v27 = vld [vmem:[#allocation5 + $0x3e4] ss:$16 sps:$4 sm:$0xff]  }
 0x14b   :  { %1270 = vmatpush1.bf16.msra.mxu0 %v3751_v37  ;;  %1416 = vmatpush1.bf16.msra.mxu1 %v3754_v38  ;;  %v3810_v28 = vld [vmem:[#allocation5 + $0x3ec] ss:$16 sps:$4 sm:$0xff]   ;;  %v3805_v29 = vld [vmem:[#allocation5 + $0x3e0] ss:$16 sps:$4 sm:$0xff]   ;;  %v3808_v20 = vld [vmem:[#allocation5 + $0x3e8] ss:$16 sps:$4 sm:$0xff]  }
 0x14c   :  { %1271 = vmatprep.subr.bf16.mxu0 %v3759_v41  ;;  %1417 = vmatprep.subr.bf16.mxu1 %v3762_v42  ;;  %v3813_v30 = vld [vmem:[#allocation7 + $0x4] ss:$16 sps:$4 sm:$0xff]   ;;  %v3816_v33 = vld [vmem:[#allocation7 + $0xc] ss:$16 sps:$4 sm:$0xff]   ;;  %v3811_v36 = vld [vmem:[#allocation7] ss:$16 sps:$4 sm:$0xff]  }
 0x14d   :  { %1289 = vmatprep.mubr.bf16.mxu0 %v4351_v10  ;;  %1435 = vmatprep.mubr.bf16.mxu1 %v4351_v10  ;;  %v3780_v10 = vld [vmem:[#allocation5 + $0x34c] ss:$16 sps:$4 sm:$0xff]   ;;  %v3814_v37 = vld [vmem:[#allocation7 + $0x8] ss:$16 sps:$4 sm:$0xff]   ;;  %v3819_v38 = vld [vmem:[#allocation7 + $0x24] ss:$16 sps:$4 sm:$0xff]  }
 0x14e   :  { %v3822_v39 = vld [vmem:[#allocation7 + $0x2c] ss:$16 sps:$4 sm:$0xff]   ;;  %v3817_v21 = vld [vmem:[#allocation7 + $0x20] ss:$16 sps:$4 sm:$0xff]   ;;  %v3820_v40 = vld [vmem:[#allocation7 + $0x28] ss:$16 sps:$4 sm:$0xff]  }
 0x14f   :  { %1272 = vmatpush1.bf16.msra.mxu0 %v3757_v50  ;;  %1418 = vmatpush1.bf16.msra.mxu1 %v3760_v51  ;;  %v3825_v41 = vld [vmem:[#allocation7 + $0x44] ss:$16 sps:$4 sm:$0xff]   ;;  %v3828_v42 = vld [vmem:[#allocation7 + $0x4c] ss:$16 sps:$4 sm:$0xff]   ;;  %v3823_v43 = vld [vmem:[#allocation7 + $0x40] ss:$16 sps:$4 sm:$0xff]  }
 0x150   :  { %1273 = vmatprep.subr.bf16.mxu0 %v3765_v55  ;;  %1419 = vmatprep.subr.bf16.mxu1 %v3768_v56  ;;  %v3826_v44 = vld [vmem:[#allocation7 + $0x48] ss:$16 sps:$4 sm:$0xff]   ;;  %v3831_v45 = vld [vmem:[#allocation7 + $0x64] ss:$16 sps:$4 sm:$0xff]   ;;  %v3840_v48 = vld [vmem:[#allocation7 + $0x8c] ss:$16 sps:$4 sm:$0xff]  }
 0x151   :  { %v3832_v46 = vld [vmem:[#allocation7 + $0x68] ss:$16 sps:$4 sm:$0xff]   ;;  %v3837_v47 = vld [vmem:[#allocation7 + $0x84] ss:$16 sps:$4 sm:$0xff]   ;;  %v3835_v49 = vld [vmem:[#allocation7 + $0x80] ss:$16 sps:$4 sm:$0xff]  }
 0x152   :  { %v3838_v50 = vld [vmem:[#allocation7 + $0x88] ss:$16 sps:$4 sm:$0xff]   ;;  %v3843_v51 = vld [vmem:[#allocation7 + $0xa4] ss:$16 sps:$4 sm:$0xff]   ;;  %v3852_v56 = vld [vmem:[#allocation7 + $0xcc] ss:$16 sps:$4 sm:$0xff]  }
 0x153   :  { %1274 = vmatpush1.bf16.msra.mxu0 %v3763_v35  ;;  %1420 = vmatpush1.bf16.msra.mxu1 %v3766_v59  ;;  %v3844_v53 = vld [vmem:[#allocation7 + $0xa8] ss:$16 sps:$4 sm:$0xff]   ;;  %v3849_v55 = vld [vmem:[#allocation7 + $0xc4] ss:$16 sps:$4 sm:$0xff]   ;;  %v3847_v57 = vld [vmem:[#allocation7 + $0xc0] ss:$16 sps:$4 sm:$0xff]  }
 0x154   :  { %1275 = vmatprep.subr.bf16.mxu0 %v3771_v60  ;;  %1421 = vmatprep.subr.bf16.mxu1 %v3774_v61  ;;  %v3850_v35 = vld [vmem:[#allocation7 + $0xc8] ss:$16 sps:$4 sm:$0xff]   ;;  %v3855_v59 = vld [vmem:[#allocation7 + $0xe4] ss:$16 sps:$4 sm:$0xff]  }
 0x155   :  { %v3856_v60 = vld [vmem:[#allocation7 + $0xe8] ss:$16 sps:$4 sm:$0xff]   ;;  %v3861_v61 = vld [vmem:[#allocation7 + $0x104] ss:$16 sps:$4 sm:$0xff]  }
 0x157   :  { %1276 = vmatpush1.bf16.msra.mxu0 %v3769_v62  ;;  %1422 = vmatpush1.bf16.msra.mxu1 %v3772_v63  ;;  %v3864_v62 = vld [vmem:[#allocation7 + $0x10c] ss:$16 sps:$4 sm:$0xff]   ;;  %v3859_v63 = vld [vmem:[#allocation7 + $0x100] ss:$16 sps:$4 sm:$0xff]  }
 0x158   :  { %1277 = vmatprep.subr.bf16.mxu0 %v3777_v0  ;;  %1423 = vmatprep.subr.bf16.mxu1 %v3780_v10  ;;  %v3862_v0 = vld [vmem:[#allocation7 + $0x108] ss:$16 sps:$4 sm:$0xff]   ;;  %v3867_v10 = vld [vmem:[#allocation7 + $0x124] ss:$16 sps:$4 sm:$0xff]  }
 0x15b   :  { %1278 = vmatpush1.bf16.msra.mxu0 %v3775_v1  ;;  %1424 = vmatpush1.bf16.msra.mxu1 %v3778_v2  ;;  %v3870_v1 = vld [vmem:[#allocation7 + $0x12c] ss:$16 sps:$4 sm:$0xff]   ;;  %v3865_v2 = vld [vmem:[#allocation7 + $0x120] ss:$16 sps:$4 sm:$0xff]  }
 0x15c   :  { %1279 = vmatprep.subr.bf16.mxu0 %v3783_v3  ;;  %1425 = vmatprep.subr.bf16.mxu1 %v3786_v4  ;;  %v3873_v3 = vld [vmem:[#allocation7 + $0x144] ss:$16 sps:$4 sm:$0xff]   ;;  %v3876_v4 = vld [vmem:[#allocation7 + $0x14c] ss:$16 sps:$4 sm:$0xff]  }
 0x15f   :  { %1280 = vmatpush1.bf16.msra.mxu0 %v3781_v5  ;;  %1426 = vmatpush1.bf16.msra.mxu1 %v3784_v6  ;;  %v3871_v5 = vld [vmem:[#allocation7 + $0x140] ss:$16 sps:$4 sm:$0xff]   ;;  %v3874_v6 = vld [vmem:[#allocation7 + $0x148] ss:$16 sps:$4 sm:$0xff]  }
 0x160   :  { %1281 = vmatprep.subr.bf16.mxu0 %v3789_v7  ;;  %1427 = vmatprep.subr.bf16.mxu1 %v3792_v9  ;;  %v3879_v7 = vld [vmem:[#allocation7 + $0x164] ss:$16 sps:$4 sm:$0xff]   ;;  %v3882_v9 = vld [vmem:[#allocation7 + $0x16c] ss:$16 sps:$4 sm:$0xff]  }
 0x163   :  { %1282 = vmatpush1.bf16.msra.mxu0 %v3787_v11  ;;  %1428 = vmatpush1.bf16.msra.mxu1 %v3790_v12  ;;  %v3877_v11 = vld [vmem:[#allocation7 + $0x160] ss:$16 sps:$4 sm:$0xff]   ;;  %v3880_v12 = vld [vmem:[#allocation7 + $0x168] ss:$16 sps:$4 sm:$0xff]  }
 0x164   :  { %1283 = vmatprep.subr.bf16.mxu0 %v3795_v13  ;;  %1429 = vmatprep.subr.bf16.mxu1 %v3798_v14  ;;  %v3885_v13 = vld [vmem:[#allocation7 + $0x184] ss:$16 sps:$4 sm:$0xff]   ;;  %v3888_v14 = vld [vmem:[#allocation7 + $0x18c] ss:$16 sps:$4 sm:$0xff]  }
 0x167   :  { %1284 = vmatpush1.bf16.msra.mxu0 %v3793_v15  ;;  %1430 = vmatpush1.bf16.msra.mxu1 %v3796_v16  ;;  %v3883_v15 = vld [vmem:[#allocation7 + $0x180] ss:$16 sps:$4 sm:$0xff]   ;;  %v3886_v16 = vld [vmem:[#allocation7 + $0x188] ss:$16 sps:$4 sm:$0xff]  }
 0x168   :  { %1285 = vmatprep.subr.bf16.mxu0 %v3801_v18  ;;  %1431 = vmatprep.subr.bf16.mxu1 %v3804_v22  ;;  %v3891_v18 = vld [vmem:[#allocation7 + $0x1a4] ss:$16 sps:$4 sm:$0xff]   ;;  %v3894_v22 = vld [vmem:[#allocation7 + $0x1ac] ss:$16 sps:$4 sm:$0xff]  }
 0x16b   :  { %1286 = vmatpush1.bf16.msra.mxu0 %v3799_v24  ;;  %1432 = vmatpush1.bf16.msra.mxu1 %v3802_v25  ;;  %v3889_v24 = vld [vmem:[#allocation7 + $0x1a0] ss:$16 sps:$4 sm:$0xff]   ;;  %v3892_v25 = vld [vmem:[#allocation7 + $0x1a8] ss:$16 sps:$4 sm:$0xff]  }
 0x16c   :  { %1287 = vmatprep.subr.bf16.mxu0 %v3807_v27  ;;  %1433 = vmatprep.subr.bf16.mxu1 %v3810_v28  ;;  %v3897_v27 = vld [vmem:[#allocation7 + $0x1c4] ss:$16 sps:$4 sm:$0xff]   ;;  %v3900_v28 = vld [vmem:[#allocation7 + $0x1cc] ss:$16 sps:$4 sm:$0xff]  }
 0x16f   :  { %1288 = vmatpush1.bf16.msra.mxu0 %v3805_v29  ;;  %1434 = vmatpush1.bf16.msra.mxu1 %v3808_v20  ;;  %v3895_v29 = vld [vmem:[#allocation7 + $0x1c0] ss:$16 sps:$4 sm:$0xff]   ;;  %v3898_v20 = vld [vmem:[#allocation7 + $0x1c8] ss:$16 sps:$4 sm:$0xff]  }
 0x170   :  { %2314 = vmatprep.subr.bf16.mxu0 %v3813_v30  ;;  %2460 = vmatprep.subr.bf16.mxu1 %v3816_v33  ;;  %v3903_v30 = vld [vmem:[#allocation7 + $0x1e4] ss:$16 sps:$4 sm:$0xff]   ;;  %v3906_v33 = vld [vmem:[#allocation7 + $0x1ec] ss:$16 sps:$4 sm:$0xff]  }
 0x172   :  { %1290 = vmatmul.mubr.bf16.vlgmr.msra.gmra.mrb[16].mxu0 %v4349_v8  ;;  %1436 = vmatmul.mubr.bf16.vlgmr.msra.gmra.mrb[16].mxu1 %v4349_v8  ;;  %v3834_v8 = vld [vmem:[#allocation7 + $0x6c] ss:$16 sps:$4 sm:$0xff]  }
 0x173   :  { %1299 = vmatprep.mubr.bf16.mxu0 %v4363_v54  ;;  %1445 = vmatprep.mubr.bf16.mxu1 %v4363_v54  ;;  %v3829_v54 = vld [vmem:[#allocation7 + $0x60] ss:$16 sps:$4 sm:$0xff]  }
 0x174   :  { %2315 = vmatpush1.bf16.msra.mxu0 %v3811_v36  ;;  %2461 = vmatpush1.bf16.msra.mxu1 %v3814_v37  ;;  %v3901_v36 = vld [vmem:[#allocation7 + $0x1e0] ss:$16 sps:$4 sm:$0xff]   ;;  %v3904_v37 = vld [vmem:[#allocation7 + $0x1e8] ss:$16 sps:$4 sm:$0xff]  }
 0x175   :  { %2316 = vmatprep.subr.bf16.mxu0 %v3819_v38  ;;  %2462 = vmatprep.subr.bf16.mxu1 %v3822_v39  ;;  %v3909_v38 = vld [vmem:[#allocation7 + $0x204] ss:$16 sps:$4 sm:$0xff]   ;;  %v3912_v39 = vld [vmem:[#allocation7 + $0x20c] ss:$16 sps:$4 sm:$0xff]  }
 0x178   :  { %2317 = vmatpush1.bf16.msra.mxu0 %v3817_v21  ;;  %2463 = vmatpush1.bf16.msra.mxu1 %v3820_v40  ;;  %v522_v21 = vld [vmem:[%s4556_s4] sm:$0xf] }
 0x179   :  { %2318 = vmatprep.subr.bf16.mxu0 %v3825_v41  ;;  %2464 = vmatprep.subr.bf16.mxu1 %v3828_v42  ;;  %v4405_v40 = vrot.slane %v522_v21, %v4314_v17  ;;  %v4408_v41 = vrot.slane %v522_v21, %v4327_v23  ;;  %v4411_v42 = vrot.slane %v522_v21, %v4319_v19 }
 0x17a   :  { %1300 = vmatmul.mubr.bf16.gmra.mrb[20].mxu0 %v4361_v52  ;;  %1446 = vmatmul.mubr.bf16.gmra.mrb[20].mxu1 %v4361_v52  ;;  %v3846_v52 = vld [vmem:[#allocation7 + $0xac] ss:$16 sps:$4 sm:$0xff]  }
 0x17b   :  { %1309 = vmatprep.mubr.bf16.mxu0 %v4375_v34  ;;  %1455 = vmatprep.mubr.bf16.mxu1 %v4375_v34  ;;  %v3841_v34 = vld [vmem:[#allocation7 + $0xa0] ss:$16 sps:$4 sm:$0xff]  }
 0x17c   :  { %2319 = vmatpush1.bf16.msra.mxu0 %v3823_v43  ;;  %2465 = vmatpush1.bf16.msra.mxu1 %v3826_v44  ;;  %v4414_v43 = vrot.slane %v522_v21, %v4330_v26  ;;  %v3924_v21 = vld [vmem:[#allocation7 + $0x24c] ss:$16 sps:$4 sm:$0xff]  }
 0x17d   :  { %2320 = vmatprep.subr.bf16.mxu0 %v3831_v45  ;;  %2466 = vmatprep.subr.bf16.mxu1 %v3834_v8 }
 0x180   :  { %2321 = vmatpush1.bf16.msra.mxu0 %v3829_v54  ;;  %2467 = vmatpush1.bf16.msra.mxu1 %v3832_v46 }
 0x181   :  { %2322 = vmatprep.subr.bf16.mxu0 %v3837_v47  ;;  %2468 = vmatprep.subr.bf16.mxu1 %v3840_v48 }
 0x182   :  { %1310 = vmatmul.mubr.bf16.gmra.mrb[24].mxu0 %v4373_v31  ;;  %1456 = vmatmul.mubr.bf16.gmra.mrb[24].mxu1 %v4373_v31  ;;  %v3858_v31 = vld [vmem:[#allocation7 + $0xec] ss:$16 sps:$4 sm:$0xff]  }
 0x183   :  { %1319 = vmatprep.mubr.bf16.mxu0 %v4385_v58  ;;  %1465 = vmatprep.mubr.bf16.mxu1 %v4385_v58  ;;  %v3853_v58 = vld [vmem:[#allocation7 + $0xe0] ss:$16 sps:$4 sm:$0xff]  }
 0x184   :  { %2323 = vmatpush1.bf16.msra.mxu0 %v3835_v49  ;;  %2469 = vmatpush1.bf16.msra.mxu1 %v3838_v50 }
 0x185   :  { %2324 = vmatprep.subr.bf16.mxu0 %v3843_v51  ;;  %2470 = vmatprep.subr.bf16.mxu1 %v3846_v52 }
 0x188   :  { %2325 = vmatpush1.bf16.msra.mxu0 %v3841_v34  ;;  %2471 = vmatpush1.bf16.msra.mxu1 %v3844_v53 }
 0x189   :  { %2326 = vmatprep.subr.bf16.mxu0 %v3849_v55  ;;  %2472 = vmatprep.subr.bf16.mxu1 %v3852_v56 }
 0x18a   :  { %1320 = vmatmul.mubr.bf16.gmra.mrb[28].mxu0 %v4383_v32  ;;  %1466 = vmatmul.mubr.bf16.gmra.mrb[28].mxu1 %v4383_v32  ;;  %v3868_v32 = vld [vmem:[#allocation7 + $0x128] ss:$16 sps:$4 sm:$0xff]  }
 0x18c   :  { %2327 = vmatpush1.bf16.msra.mxu0 %v3847_v57  ;;  %2473 = vmatpush1.bf16.msra.mxu1 %v3850_v35 }
 0x18d   :  { %2328 = vmatprep.subr.bf16.mxu0 %v3855_v59  ;;  %2474 = vmatprep.subr.bf16.mxu1 %v3858_v31 }
 0x190   :  { %2329 = vmatpush1.bf16.msra.mxu0 %v3853_v58  ;;  %2475 = vmatpush1.bf16.msra.mxu1 %v3856_v60 }
 0x191   :  { %2330 = vmatprep.subr.bf16.mxu0 %v3861_v61  ;;  %2476 = vmatprep.subr.bf16.mxu1 %v3864_v62 }
 0x194   :  { %2331 = vmatpush1.bf16.msra.mxu0 %v3859_v63  ;;  %2477 = vmatpush1.bf16.msra.mxu1 %v3862_v0 }
 0x195   :  { %2332 = vmatprep.subr.bf16.mxu0 %v3867_v10  ;;  %2478 = vmatprep.subr.bf16.mxu1 %v3870_v1 }
 0x198   :  { %2333 = vmatpush1.bf16.msra.mxu0 %v3865_v2  ;;  %2479 = vmatpush1.bf16.msra.mxu1 %v3868_v32 }
 0x199   :  { %2334 = vmatprep.subr.bf16.mxu0 %v3873_v3  ;;  %2480 = vmatprep.subr.bf16.mxu1 %v3876_v4  ;;  %v3907_v4 = vld [vmem:[#allocation7 + $0x200] ss:$16 sps:$4 sm:$0xff]  }
 0x19c   :  { %2335 = vmatpush1.bf16.msra.mxu0 %v3871_v5  ;;  %2481 = vmatpush1.bf16.msra.mxu1 %v3874_v6  ;;  %v3910_v5 = vld [vmem:[#allocation7 + $0x208] ss:$16 sps:$4 sm:$0xff]  }
 0x19d   :  { %2336 = vmatprep.subr.bf16.mxu0 %v3879_v7  ;;  %2482 = vmatprep.subr.bf16.mxu1 %v3882_v9 }
 0x1a0   :  { %2337 = vmatpush1.bf16.msra.mxu0 %v3877_v11  ;;  %2483 = vmatpush1.bf16.msra.mxu1 %v3880_v12  ;;  %v3915_v12 = vld [vmem:[#allocation7 + $0x224] ss:$16 sps:$4 sm:$0xff]  }
 0x1a1   :  { %2338 = vmatprep.subr.bf16.mxu0 %v3885_v13  ;;  %2484 = vmatprep.subr.bf16.mxu1 %v3888_v14  ;;  %v3918_v13 = vld [vmem:[#allocation7 + $0x22c] ss:$16 sps:$4 sm:$0xff]  }
 0x1a4   :  { %2339 = vmatpush1.bf16.msra.mxu0 %v3883_v15  ;;  %2485 = vmatpush1.bf16.msra.mxu1 %v3886_v16 }
 0x1a5   :  { %2340 = vmatprep.subr.bf16.mxu0 %v3891_v18  ;;  %2486 = vmatprep.subr.bf16.mxu1 %v3894_v22 }
 0x1a8   :  { %2341 = vmatpush1.bf16.msra.mxu0 %v3889_v24  ;;  %2487 = vmatpush1.bf16.msra.mxu1 %v3892_v25 }
 0x1a9   :  { %2342 = vmatprep.subr.bf16.mxu0 %v3897_v27  ;;  %2488 = vmatprep.subr.bf16.mxu1 %v3900_v28 }
 0x1ac   :  { %2343 = vmatpush1.bf16.msra.mxu0 %v3895_v29  ;;  %2489 = vmatpush1.bf16.msra.mxu1 %v3898_v20  ;;  %v3913_v20 = vld [vmem:[#allocation7 + $0x220] ss:$16 sps:$4 sm:$0xff]  }
 0x1ad   :  { %2344 = vmatprep.subr.bf16.mxu0 %v3903_v30  ;;  %2490 = vmatprep.subr.bf16.mxu1 %v3906_v33  ;;  %v3916_v30 = vld [vmem:[#allocation7 + $0x228] ss:$16 sps:$4 sm:$0xff]   ;;  %v3921_v33 = vld [vmem:[#allocation7 + $0x244] ss:$16 sps:$4 sm:$0xff]  }
 0x1b0   :  { %2345 = vmatpush1.bf16.msra.mxu0 %v3901_v36  ;;  %2491 = vmatpush1.bf16.msra.mxu1 %v3904_v37 }
 0x1b1   :  { %2387 = vmatprep.subr.bf16.mxu0 %v3909_v38  ;;  %2533 = vmatprep.subr.bf16.mxu1 %v3912_v39 }
 0x245   :  { %v1291_v44 = vpop.f32.mrb[16].mxu0  ;;  %v1437_v45 = vpop.f32.mrb[16].mxu1 }
 0x246   :  { %v3463_v8 = vadd.f32 %v1291_v44, %v4405_v40  ;;  %v3479_v54 = vadd.f32 %v1437_v45, %v4408_v41  ;;  %v1293_v46 = vpop.f32.mrb[17].mxu0  ;;  %v1439_v47 = vpop.f32.mrb[17].mxu1 }
 0x247   :  { %v3464_v48 = vadd.f32 %v1293_v46, %v4411_v42  ;;  %v3480_v49 = vadd.f32 %v1439_v47, %v4414_v43  ;;  %v1295_v50 = vpop.f32.mrb[18].mxu0  ;;  %v1441_v51 = vpop.f32.mrb[18].mxu1 }
 0x248   :  { %v3465_v52 = vadd.f32 %v1295_v50, %v4405_v40  ;;  %v3481_v34 = vadd.f32 %v1441_v51, %v4408_v41  ;;  %v1297_v53 = vpop.f32.mrb[19].mxu0  ;;  %v1443_v55 = vpop.f32.mrb[19].mxu1  ;;  %v1476_v35 = vmax.f32 %v3463_v8, 0.0  ;;  %v1478_v59 = vmax.f32 %v3479_v54, 0.0 }
 0x249   :  { %v3466_v56 = vadd.f32 %v1297_v53, %v4411_v42  ;;  %v3482_v57 = vadd.f32 %v1443_v55, %v4414_v43  ;;  %v1477_v60 = vmax.f32 %v3464_v48, 0.0  ;;  %v1479_v61 = vmax.f32 %v3480_v49, 0.0 }
 0x24a   :  { %v1480_v31 = vmax.f32 %v3465_v52, 0.0  ;;  %v1482_v58 = vmax.f32 %v3481_v34, 0.0  ;;  %v3919_v52 = vld [vmem:[#allocation7 + $0x240] ss:$16 sps:$4 sm:$0xff]   ;;  %v3922_v34 = vld [vmem:[#allocation7 + $0x248] ss:$16 sps:$4 sm:$0xff]  }
 0x24b   :  { %v1481_v62 = vmax.f32 %v3466_v56, 0.0  ;;  %v1483_v63 = vmax.f32 %v3482_v57, 0.0 }
 0x24c   :  { %v1508_v0 = vpack.c.bf16 %v1480_v31, %v1476_v35  ;;  %v4424_v10 = vpack.c.bf16 %v1482_v58, %v1478_v59  ;;  %v3927_v35 = vld [vmem:[#allocation7 + $0x264] ss:$16 sps:$4 sm:$0xff]   ;;  %v3930_v59 = vld [vmem:[#allocation7 + $0x26c] ss:$16 sps:$4 sm:$0xff]  }
 0x24d   :  { %v1509_v1 = vpack.c.bf16 %v1481_v62, %v1477_v60  ;;  %v4426_v2 = vpack.c.bf16 %v1483_v63, %v1479_v61  ;;  %v1301_v32 = vpop.f32.mrb[20].mxu0  ;;  %v1447_v3 = vpop.f32.mrb[20].mxu1 }
 0x24e   :  { %v3467_v6 = vadd.f32 %v1301_v32, %v4405_v40  ;;  %v3483_v7 = vadd.f32 %v1447_v3, %v4408_v41  ;;  %v1303_v9 = vpop.f32.mrb[21].mxu0  ;;  %v1449_v11 = vpop.f32.mrb[21].mxu1 }
 0x24f   :  { %v3468_v14 = vadd.f32 %v1303_v9, %v4411_v42  ;;  %v3484_v15 = vadd.f32 %v1449_v11, %v4414_v43  ;;  %v1305_v16 = vpop.f32.mrb[22].mxu0  ;;  %v1451_v18 = vpop.f32.mrb[22].mxu1  ;;  %2346 = vmatprep.mubr.bf16.mxu0 %v1509_v1  ;;  %2492 = vmatprep.mubr.bf16.mxu1 %v1509_v1 }
 0x250   :  { %v3469_v22 = vadd.f32 %v1305_v16, %v4405_v40  ;;  %v3485_v24 = vadd.f32 %v1451_v18, %v4408_v41  ;;  %v1307_v25 = vpop.f32.mrb[23].mxu0  ;;  %v1453_v27 = vpop.f32.mrb[23].mxu1  ;;  %2347 = vmatmul.mubr.bf16.vlgmr.msra.gmra.mrb[32].mxu0 %v1508_v0  ;;  %2493 = vmatmul.mubr.bf16.vlgmr.msra.gmra.mrb[32].mxu1 %v1508_v0  ;;  %v1484_v36 = vmax.f32 %v3467_v6, 0.0  ;;  %v1486_v37 = vmax.f32 %v3483_v7, 0.0  ;;  %v3933_v6 = vld [vmem:[#allocation7 + $0x284] ss:$16 sps:$4 sm:$0xff]  }
 0x251   :  { %v3470_v28 = vadd.f32 %v1307_v25, %v4411_v42  ;;  %v3486_v29 = vadd.f32 %v1453_v27, %v4414_v43  ;;  %2388 = vmatpush1.bf16.msra.mxu0 %v3907_v4  ;;  %2534 = vmatpush1.bf16.msra.mxu1 %v3910_v5  ;;  %v1485_v44 = vmax.f32 %v3468_v14, 0.0  ;;  %v1487_v45 = vmax.f32 %v3484_v15, 0.0  ;;  %v3925_v4 = vld [vmem:[#allocation7 + $0x260] ss:$16 sps:$4 sm:$0xff]   ;;  %v3928_v5 = vld [vmem:[#allocation7 + $0x268] ss:$16 sps:$4 sm:$0xff]  }
 0x252   :  { %v1488_v38 = vmax.f32 %v3469_v22, 0.0  ;;  %v1490_v39 = vmax.f32 %v3485_v24, 0.0  ;;  %2389 = vmatprep.subr.bf16.mxu0 %v3915_v12  ;;  %2535 = vmatprep.subr.bf16.mxu1 %v3918_v13  ;;  %v3936_v13 = vld [vmem:[#allocation7 + $0x28c] ss:$16 sps:$4 sm:$0xff]  }
 0x253   :  { %v1489_v8 = vmax.f32 %v3470_v28, 0.0  ;;  %v1491_v54 = vmax.f32 %v3486_v29, 0.0 }
 0x254   :  { %v1512_v46 = vpack.c.bf16 %v1488_v38, %v1484_v36  ;;  %v4436_v47 = vpack.c.bf16 %v1490_v39, %v1486_v37  ;;  %v3939_v39 = vld [vmem:[#allocation7 + $0x2a4] ss:$16 sps:$4 sm:$0xff]  }
 0x255   :  { %v1513_v48 = vpack.c.bf16 %v1489_v8, %v1485_v44  ;;  %v4438_v49 = vpack.c.bf16 %v1491_v54, %v1487_v45  ;;  %2390 = vmatpush1.bf16.msra.mxu0 %v3913_v20  ;;  %2536 = vmatpush1.bf16.msra.mxu1 %v3916_v30  ;;  %v1311_v50 = vpop.f32.mrb[24].mxu0  ;;  %v1457_v51 = vpop.f32.mrb[24].mxu1  ;;  %v3931_v20 = vld [vmem:[#allocation7 + $0x280] ss:$16 sps:$4 sm:$0xff]   ;;  %v3934_v30 = vld [vmem:[#allocation7 + $0x288] ss:$16 sps:$4 sm:$0xff]  }
 0x256   :  { %v3471_v53 = vadd.f32 %v1311_v50, %v4405_v40  ;;  %v3487_v55 = vadd.f32 %v1457_v51, %v4408_v41  ;;  %v1313_v56 = vpop.f32.mrb[25].mxu0  ;;  %v1459_v57 = vpop.f32.mrb[25].mxu1  ;;  %2391 = vmatprep.subr.bf16.mxu0 %v3921_v33  ;;  %2537 = vmatprep.subr.bf16.mxu1 %v3924_v21  ;;  %v3942_v21 = vld [vmem:[#allocation7 + $0x2ac] ss:$16 sps:$4 sm:$0xff]  }
 0x257   :  { %v3472_v31 = vadd.f32 %v1313_v56, %v4411_v42  ;;  %v3488_v58 = vadd.f32 %v1459_v57, %v4414_v43  ;;  %v1315_v60 = vpop.f32.mrb[26].mxu0  ;;  %v1461_v61 = vpop.f32.mrb[26].mxu1  ;;  %2356 = vmatprep.mubr.bf16.mxu0 %v1513_v48  ;;  %2502 = vmatprep.mubr.bf16.mxu1 %v1513_v48  ;;  %v3945_v56 = vld [vmem:[#allocation7 + $0x2c4] ss:$16 sps:$4 sm:$0xff]  }
 0x258   :  { %v3473_v62 = vadd.f32 %v1315_v60, %v4405_v40  ;;  %v3489_v63 = vadd.f32 %v1461_v61, %v4408_v41  ;;  %v1317_v0 = vpop.f32.mrb[27].mxu0  ;;  %v1463_v1 = vpop.f32.mrb[27].mxu1  ;;  %2357 = vmatmul.mubr.bf16.gmra.mrb[36].mxu0 %v1512_v46  ;;  %2503 = vmatmul.mubr.bf16.gmra.mrb[36].mxu1 %v1512_v46  ;;  %v1492_v7 = vmax.f32 %v3471_v53, 0.0  ;;  %v1494_v9 = vmax.f32 %v3487_v55, 0.0  ;;  %v3937_v53 = vld [vmem:[#allocation7 + $0x2a0] ss:$16 sps:$4 sm:$0xff]  }
 0x259   :  { %v3474_v32 = vadd.f32 %v1317_v0, %v4411_v42  ;;  %v3490_v3 = vadd.f32 %v1463_v1, %v4414_v43  ;;  %2392 = vmatpush1.bf16.msra.mxu0 %v3919_v52  ;;  %2538 = vmatpush1.bf16.msra.mxu1 %v3922_v34  ;;  %v1493_v14 = vmax.f32 %v3472_v31, 0.0  ;;  %v1495_v15 = vmax.f32 %v3488_v58, 0.0  ;;  %v3940_v55 = vld [vmem:[#allocation7 + $0x2a8] ss:$16 sps:$4 sm:$0xff]   ;;  %v3943_v0 = vld [vmem:[#allocation7 + $0x2c0] ss:$16 sps:$4 sm:$0xff]  }
 0x25a   :  { %v1496_v11 = vmax.f32 %v3473_v62, 0.0  ;;  %v1498_v12 = vmax.f32 %v3489_v63, 0.0  ;;  %2393 = vmatprep.subr.bf16.mxu0 %v3927_v35  ;;  %2539 = vmatprep.subr.bf16.mxu1 %v3930_v59  ;;  %v3946_v1 = vld [vmem:[#allocation7 + $0x2c8] ss:$16 sps:$4 sm:$0xff]  }
 0x25b   :  { %v1497_v16 = vmax.f32 %v3474_v32, 0.0  ;;  %v1499_v18 = vmax.f32 %v3490_v3, 0.0  ;;  %v3951_v32 = vld [vmem:[#allocation7 + $0x2e4] ss:$16 sps:$4 sm:$0xff]   ;;  %v3954_v3 = vld [vmem:[#allocation7 + $0x2ec] ss:$16 sps:$4 sm:$0xff]  }
 0x25c   :  { %v1516_v22 = vpack.c.bf16 %v1496_v11, %v1492_v7  ;;  %v4448_v24 = vpack.c.bf16 %v1498_v12, %v1494_v9  ;;  %v3960_v7 = vld [vmem:[#allocation7 + $0x30c] ss:$16 sps:$4 sm:$0xff]   ;;  %v3955_v9 = vld [vmem:[#allocation7 + $0x300] ss:$16 sps:$4 sm:$0xff]   ;;  %v3958_v11 = vld [vmem:[#allocation7 + $0x308] ss:$16 sps:$4 sm:$0xff]  }
 0x25d   :  { %v1517_v25 = vpack.c.bf16 %v1497_v16, %v1493_v14  ;;  %v4450_v27 = vpack.c.bf16 %v1499_v18, %v1495_v15  ;;  %2394 = vmatpush1.bf16.msra.mxu0 %v3925_v4  ;;  %2540 = vmatpush1.bf16.msra.mxu1 %v3928_v5  ;;  %v1321_v28 = vpop.f32.mrb[28].mxu0  ;;  %v1467_v29 = vpop.f32.mrb[28].mxu1  ;;  %v3949_v4 = vld [vmem:[#allocation7 + $0x2e0] ss:$16 sps:$4 sm:$0xff]   ;;  %v3952_v5 = vld [vmem:[#allocation7 + $0x2e8] ss:$16 sps:$4 sm:$0xff]  }
 0x25e   :  { %v3475_v33 = vadd.f32 %v1321_v28, %v4405_v40  ;;  %v3491_v36 = vadd.f32 %v1467_v29, %v4408_v41  ;;  %v1323_v37 = vpop.f32.mrb[29].mxu0  ;;  %v1469_v38 = vpop.f32.mrb[29].mxu1  ;;  %2395 = vmatprep.subr.bf16.mxu0 %v3933_v6  ;;  %2541 = vmatprep.subr.bf16.mxu1 %v3936_v13  ;;  %v3957_v6 = vld [vmem:[#allocation7 + $0x304] ss:$16 sps:$4 sm:$0xff]   ;;  %v3966_v13 = vld [vmem:[#allocation7 + $0x32c] ss:$16 sps:$4 sm:$0xff]  }
 0x25f   :  { %v3476_v44 = vadd.f32 %v1323_v37, %v4411_v42  ;;  %v3492_v45 = vadd.f32 %v1469_v38, %v4414_v43  ;;  %v1325_v8 = vpop.f32.mrb[30].mxu0  ;;  %v1471_v54 = vpop.f32.mrb[30].mxu1  ;;  %2366 = vmatprep.mubr.bf16.mxu0 %v1517_v25  ;;  %2512 = vmatprep.mubr.bf16.mxu1 %v1517_v25  ;;  %v3963_v12 = vld [vmem:[#allocation7 + $0x324] ss:$16 sps:$4 sm:$0xff]   ;;  %v3961_v14 = vld [vmem:[#allocation7 + $0x320] ss:$16 sps:$4 sm:$0xff]  }
 0x260   :  { %v3477_v46 = vadd.f32 %v1325_v8, %v4405_v40  ;;  %v3493_v48 = vadd.f32 %v1471_v54, %v4408_v41  ;;  %v1327_v50 = vpop.f32.mrb[31].mxu0  ;;  %v1473_v51 = vpop.f32.mrb[31].mxu1  ;;  %2367 = vmatmul.mubr.bf16.gmra.mrb[40].mxu0 %v1516_v22  ;;  %2513 = vmatmul.mubr.bf16.gmra.mrb[40].mxu1 %v1516_v22  ;;  %v1500_v57 = vmax.f32 %v3475_v33, 0.0  ;;  %v1502_v35 = vmax.f32 %v3491_v36, 0.0  ;;  %v3948_v40 = vld [vmem:[#allocation7 + $0x2cc] ss:$16 sps:$4 sm:$0xff]  }
 0x261   :  { %v3478_v52 = vadd.f32 %v1327_v50, %v4411_v42  ;;  %v3494_v34 = vadd.f32 %v1473_v51, %v4414_v43  ;;  %2396 = vmatpush1.bf16.msra.mxu0 %v3931_v20  ;;  %2542 = vmatpush1.bf16.msra.mxu1 %v3934_v30  ;;  %v1501_v41 = vmax.f32 %v3476_v44, 0.0  ;;  %v1503_v58 = vmax.f32 %v3492_v45, 0.0  ;;  %v3964_v15 = vld [vmem:[#allocation7 + $0x328] ss:$16 sps:$4 sm:$0xff]   ;;  %v3969_v16 = vld [vmem:[#allocation7 + $0x344] ss:$16 sps:$4 sm:$0xff]  }
 0x262   :  { %v1504_v59 = vmax.f32 %v3477_v46, 0.0  ;;  %v1506_v31 = vmax.f32 %v3493_v48, 0.0  ;;  %2397 = vmatprep.subr.bf16.mxu0 %v3939_v39  ;;  %2543 = vmatprep.subr.bf16.mxu1 %v3942_v21  ;;  %v3967_v18 = vld [vmem:[#allocation7 + $0x340] ss:$16 sps:$4 sm:$0xff]   ;;  %v3970_v22 = vld [vmem:[#allocation7 + $0x348] ss:$16 sps:$4 sm:$0xff]  }
 0x263   :  { %v1505_v60 = vmax.f32 %v3478_v52, 0.0  ;;  %v1507_v61 = vmax.f32 %v3494_v34, 0.0  ;;  %v3975_v25 = vld [vmem:[#allocation7 + $0x364] ss:$16 sps:$4 sm:$0xff]   ;;  %v3978_v28 = vld [vmem:[#allocation7 + $0x36c] ss:$16 sps:$4 sm:$0xff]  }
 0x264   :  { %v1520_v62 = vpack.c.bf16 %v1504_v59, %v1500_v57  ;;  %v4460_v42 = vpack.c.bf16 %v1506_v31, %v1502_v35  ;;  %v3973_v29 = vld [vmem:[#allocation7 + $0x360] ss:$16 sps:$4 sm:$0xff]   ;;  %v3976_v20 = vld [vmem:[#allocation7 + $0x368] ss:$16 sps:$4 sm:$0xff]   ;;  %v3981_v30 = vld [vmem:[#allocation7 + $0x384] ss:$16 sps:$4 sm:$0xff]  }
 0x265   :  { %v1521_v43 = vpack.c.bf16 %v1505_v60, %v1501_v41  ;;  %v4462_v63 = vpack.c.bf16 %v1507_v61, %v1503_v58  ;;  %2398 = vmatpush1.bf16.msra.mxu0 %v3937_v53  ;;  %2544 = vmatpush1.bf16.msra.mxu1 %v3940_v55  ;;  %v3984_v33 = vld [vmem:[#allocation7 + $0x38c] ss:$16 sps:$4 sm:$0xff]   ;;  %v3979_v36 = vld [vmem:[#allocation7 + $0x380] ss:$16 sps:$4 sm:$0xff]   ;;  %v3982_v37 = vld [vmem:[#allocation7 + $0x388] ss:$16 sps:$4 sm:$0xff]  }
 0x266   :  { %2399 = vmatprep.subr.bf16.mxu0 %v3945_v56  ;;  %2545 = vmatprep.subr.bf16.mxu1 %v3948_v40  ;;  %v3987_v38 = vld [vmem:[#allocation7 + $0x3a4] ss:$16 sps:$4 sm:$0xff]   ;;  %v3990_v39 = vld [vmem:[#allocation7 + $0x3ac] ss:$16 sps:$4 sm:$0xff]   ;;  %v3985_v21 = vld [vmem:[#allocation7 + $0x3a0] ss:$16 sps:$4 sm:$0xff]  }
 0x267   :  { %2376 = vmatprep.mubr.bf16.mxu0 %v1521_v43  ;;  %2522 = vmatprep.mubr.bf16.mxu1 %v1521_v43  ;;  %v3988_v44 = vld [vmem:[#allocation7 + $0x3a8] ss:$16 sps:$4 sm:$0xff]   ;;  %v3993_v45 = vld [vmem:[#allocation7 + $0x3c4] ss:$16 sps:$4 sm:$0xff]   ;;  %v3996_v8 = vld [vmem:[#allocation7 + $0x3cc] ss:$16 sps:$4 sm:$0xff]  }
 0x268   :  { %2377 = vmatmul.mubr.bf16.gmra.mrb[44].mxu0 %v1520_v62  ;;  %2523 = vmatmul.mubr.bf16.gmra.mrb[44].mxu1 %v1520_v62  ;;  %v3991_v54 = vld [vmem:[#allocation7 + $0x3c0] ss:$16 sps:$4 sm:$0xff]   ;;  %v3994_v46 = vld [vmem:[#allocation7 + $0x3c8] ss:$16 sps:$4 sm:$0xff]   ;;  %v3999_v48 = vld [vmem:[#allocation7 + $0x3e4] ss:$16 sps:$4 sm:$0xff]  }
 0x269   :  { %2400 = vmatpush1.bf16.msra.mxu0 %v3943_v0  ;;  %2546 = vmatpush1.bf16.msra.mxu1 %v3946_v1  ;;  %v4002_v50 = vld [vmem:[#allocation7 + $0x3ec] ss:$16 sps:$4 sm:$0xff]   ;;  %v3997_v51 = vld [vmem:[#allocation7 + $0x3e0] ss:$16 sps:$4 sm:$0xff]   ;;  %v4000_v52 = vld [vmem:[#allocation7 + $0x3e8] ss:$16 sps:$4 sm:$0xff]  }
 0x26a   :  { %2419 = vmatprep.mubr.bf16.mxu0 %v4426_v2  ;;  %2565 = vmatprep.mubr.bf16.mxu1 %v4426_v2  ;;  %v3972_v2 = vld [vmem:[#allocation7 + $0x34c] ss:$16 sps:$4 sm:$0xff]   ;;  %v4003_v34 = vld [vmem:[#allocation8 + $0x40] sm:$0xff]   ;;  %v4011_v40 = vld [vmem:[#allocation8 + $0x50] sm:$0xff]  }
 0x26b   :  { %2401 = vmatprep.subr.bf16.mxu0 %v3951_v32  ;;  %2547 = vmatprep.subr.bf16.mxu1 %v3954_v3  ;;  %v4005_v53 = vld [vmem:[#allocation8 + $0xc0] sm:$0xff]   ;;  %v4007_v57 = vld [vmem:[#allocation8 + $0x48] sm:$0xff]   ;;  %v4013_v41 = vld [vmem:[#allocation8 + $0xd0] sm:$0xff]  }
 0x26c   :  { %v4004_v55 = vld [vmem:[#allocation8] sm:$0xff]   ;;  %v4009_v35 = vld [vmem:[#allocation8 + $0xc8] sm:$0xff]   ;;  %v4012_v58 = vld [vmem:[#allocation8 + $0x10] sm:$0xff]  }
 0x26d   :  { %2402 = vmatpush1.bf16.msra.mxu0 %v3949_v4  ;;  %2548 = vmatpush1.bf16.msra.mxu1 %v3952_v5  ;;  %v4006_v56 = vld [vmem:[#allocation8 + $0x80] sm:$0xff]   ;;  %v4008_v59 = vld [vmem:[#allocation8 + $0x8] sm:$0xff]   ;;  %v4014_v60 = vld [vmem:[#allocation8 + $0x90] sm:$0xff]  }
 0x26e   :  { %2403 = vmatprep.subr.bf16.mxu0 %v3957_v6  ;;  %2549 = vmatprep.subr.bf16.mxu1 %v3960_v7  ;;  %v4010_v31 = vld [vmem:[#allocation8 + $0x88] sm:$0xff]   ;;  %v4015_v61 = vld [vmem:[#allocation8 + $0x58] sm:$0xff]   ;;  %v4019_v43 = vld [vmem:[#allocation8 + $0x60] sm:$0xff]  }
 0x26f   :  { %v4018_v62 = vld [vmem:[#allocation8 + $0x98] sm:$0xff]   ;;  %v4021_v0 = vld [vmem:[#allocation8 + $0xe0] sm:$0xff]   ;;  %v4023_v3 = vld [vmem:[#allocation8 + $0x68] sm:$0xff]  }
 0x270   :  { %v4020_v1 = vld [vmem:[#allocation8 + $0x20] sm:$0xff]   ;;  %v4026_v4 = vld [vmem:[#allocation8 + $0xa8] sm:$0xff]   ;;  %v4027_v5 = vld [vmem:[#allocation8 + $0x70] sm:$0xff]  }
 0x271   :  { %2404 = vmatpush1.bf16.msra.mxu0 %v3955_v9  ;;  %2550 = vmatpush1.bf16.msra.mxu1 %v3958_v11  ;;  %v4022_v32 = vld [vmem:[#allocation8 + $0xa0] sm:$0xff]   ;;  %v4029_v6 = vld [vmem:[#allocation8 + $0xf0] sm:$0xff]   ;;  %v4033_v9 = vld [vmem:[#allocation8 + $0xf8] sm:$0xff]  }
 0x272   :  { %2405 = vmatprep.subr.bf16.mxu0 %v3963_v12  ;;  %2551 = vmatprep.subr.bf16.mxu1 %v3966_v13  ;;  %v4028_v7 = vld [vmem:[#allocation8 + $0x30] sm:$0xff]   ;;  %v4032_v11 = vld [vmem:[#allocation8 + $0x38] sm:$0xff]  }
 0x273   :  { %v4034_v12 = vld [vmem:[#allocation8 + $0xb8] sm:$0xff]  }
 0x275   :  { %2406 = vmatpush1.bf16.msra.mxu0 %v3961_v14  ;;  %2552 = vmatpush1.bf16.msra.mxu1 %v3964_v15 }
 0x276   :  { %2407 = vmatprep.subr.bf16.mxu0 %v3969_v16  ;;  %2553 = vmatprep.subr.bf16.mxu1 %v3972_v2 }
 0x279   :  { %2408 = vmatpush1.bf16.msra.mxu0 %v3967_v18  ;;  %2554 = vmatpush1.bf16.msra.mxu1 %v3970_v22 }
 0x27a   :  { %2409 = vmatprep.subr.bf16.mxu0 %v3975_v25  ;;  %2555 = vmatprep.subr.bf16.mxu1 %v3978_v28 }
 0x27d   :  { %2410 = vmatpush1.bf16.msra.mxu0 %v3973_v29  ;;  %2556 = vmatpush1.bf16.msra.mxu1 %v3976_v20 }
 0x27e   :  { %2411 = vmatprep.subr.bf16.mxu0 %v3981_v30  ;;  %2557 = vmatprep.subr.bf16.mxu1 %v3984_v33 }
 0x281   :  { %2412 = vmatpush1.bf16.msra.mxu0 %v3979_v36  ;;  %2558 = vmatpush1.bf16.msra.mxu1 %v3982_v37 }
 0x282   :  { %2413 = vmatprep.subr.bf16.mxu0 %v3987_v38  ;;  %2559 = vmatprep.subr.bf16.mxu1 %v3990_v39 }
 0x285   :  { %2414 = vmatpush1.bf16.msra.mxu0 %v3985_v21  ;;  %2560 = vmatpush1.bf16.msra.mxu1 %v3988_v44 }
 0x286   :  { %2415 = vmatprep.subr.bf16.mxu0 %v3993_v45  ;;  %2561 = vmatprep.subr.bf16.mxu1 %v3996_v8 }
 0x289   :  { %2416 = vmatpush1.bf16.msra.mxu0 %v3991_v54  ;;  %2562 = vmatpush1.bf16.msra.mxu1 %v3994_v46 }
 0x28a   :  { %2417 = vmatprep.subr.bf16.mxu0 %v3999_v48  ;;  %2563 = vmatprep.subr.bf16.mxu1 %v4002_v50 }
 0x28d   :  { %2418 = vmatpush1.bf16.msra.mxu0 %v3997_v51  ;;  %2564 = vmatpush1.bf16.msra.mxu1 %v4000_v52 }
 0x28e   :  { %3383 = vmatprep.subr.bf16.mxu0 %v4003_v34  ;;  %3423 = vmatprep.subr.bf16.mxu1 %v4005_v53 }
 0x290   :  { %2420 = vmatmul.mubr.bf16.vlgmr.msra.gmra.mrb[32].mxu0 %v4424_v10  ;;  %2566 = vmatmul.mubr.bf16.vlgmr.msra.gmra.mrb[32].mxu1 %v4424_v10  ;;  %v4017_v10 = vld [vmem:[#allocation8 + $0xd8] sm:$0xff]  }
 0x291   :  { %2429 = vmatprep.mubr.bf16.mxu0 %v4438_v49  ;;  %2575 = vmatprep.mubr.bf16.mxu1 %v4438_v49  ;;  %v4016_v49 = vld [vmem:[#allocation8 + $0x18] sm:$0xff]  }
 0x292   :  { %3384 = vmatpush3.bf16.msra.mxu0 %v4004_v55  ;;  %3424 = vmatpush3.bf16.msra.mxu1 %v4006_v56 }
 0x293   :  { %3385 = vmatprep.subr.bf16.mxu0 %v4007_v57  ;;  %3425 = vmatprep.subr.bf16.mxu1 %v4009_v35 }
 0x296   :  { %3386 = vmatpush3.bf16.msra.mxu0 %v4008_v59  ;;  %3426 = vmatpush3.bf16.msra.mxu1 %v4010_v31 }
 0x297   :  { %3387 = vmatprep.subr.bf16.mxu0 %v4011_v40  ;;  %3427 = vmatprep.subr.bf16.mxu1 %v4013_v41 }
 0x298   :  { %2430 = vmatmul.mubr.bf16.gmra.mrb[36].mxu0 %v4436_v47  ;;  %2576 = vmatmul.mubr.bf16.gmra.mrb[36].mxu1 %v4436_v47  ;;  %v4025_v47 = vld [vmem:[#allocation8 + $0xe8] sm:$0xff]  }
 0x299   :  { %2439 = vmatprep.mubr.bf16.mxu0 %v4450_v27  ;;  %2585 = vmatprep.mubr.bf16.mxu1 %v4450_v27  ;;  %v4024_v27 = vld [vmem:[#allocation8 + $0x28] sm:$0xff]  }
 0x29a   :  { %3388 = vmatpush3.bf16.msra.mxu0 %v4012_v58  ;;  %3428 = vmatpush3.bf16.msra.mxu1 %v4014_v60 }
 0x29b   :  { %3389 = vmatprep.subr.bf16.mxu0 %v4015_v61  ;;  %3429 = vmatprep.subr.bf16.mxu1 %v4017_v10 }
 0x29e   :  { %3390 = vmatpush3.bf16.msra.mxu0 %v4016_v49  ;;  %3430 = vmatpush3.bf16.msra.mxu1 %v4018_v62 }
 0x29f   :  { %3391 = vmatprep.subr.bf16.mxu0 %v4019_v43  ;;  %3431 = vmatprep.subr.bf16.mxu1 %v4021_v0 }
 0x2a0   :  { %2440 = vmatmul.mubr.bf16.gmra.mrb[40].mxu0 %v4448_v24  ;;  %2586 = vmatmul.mubr.bf16.gmra.mrb[40].mxu1 %v4448_v24  ;;  %v4030_v24 = vld [vmem:[#allocation8 + $0xb0] sm:$0xff]  }
 0x2a1   :  { %2449 = vmatprep.mubr.bf16.mxu0 %v4462_v63  ;;  %2595 = vmatprep.mubr.bf16.mxu1 %v4462_v63  ;;  %v4031_v63 = vld [vmem:[#allocation8 + $0x78] sm:$0xff]  }
 0x2a2   :  { %3392 = vmatpush3.bf16.msra.mxu0 %v4020_v1  ;;  %3432 = vmatpush3.bf16.msra.mxu1 %v4022_v32 }
 0x2a3   :  { %3393 = vmatprep.subr.bf16.mxu0 %v4023_v3  ;;  %3433 = vmatprep.subr.bf16.mxu1 %v4025_v47 }
 0x2a6   :  { %3394 = vmatpush3.bf16.msra.mxu0 %v4024_v27  ;;  %3434 = vmatpush3.bf16.msra.mxu1 %v4026_v4 }
 0x2a7   :  { %3395 = vmatprep.subr.bf16.mxu0 %v4027_v5  ;;  %3435 = vmatprep.subr.bf16.mxu1 %v4029_v6 }
 0x2a8   :  { %2450 = vmatmul.mubr.bf16.gmra.mrb[44].mxu0 %v4460_v42  ;;  %2596 = vmatmul.mubr.bf16.gmra.mrb[44].mxu1 %v4460_v42  ;;  %v1652_v42 = vld [vmem:[%s4558_s6] sm:$0xf] }
 0x2a9   :  { %v4484_v13 = vrot.slane %v1652_v42, %v4314_v17  ;;  %v4487_v14 = vrot.slane %v1652_v42, %v4327_v23  ;;  %v4490_v15 = vrot.slane %v1652_v42, %v4319_v19  ;;  %v4493_v16 = vrot.slane %v1652_v42, %v4330_v26 }
 0x2aa   :  { %3396 = vmatpush3.bf16.msra.mxu0 %v4028_v7  ;;  %3436 = vmatpush3.bf16.msra.mxu1 %v4030_v24 }
 0x2ab   :  { %3397 = vmatprep.subr.bf16.mxu0 %v4031_v63  ;;  %3437 = vmatprep.subr.bf16.mxu1 %v4033_v9 }
 0x2ae   :  { %3398 = vmatpush3.bf16.msra.mxu0 %v4032_v11  ;;  %3438 = vmatpush3.bf16.msra.mxu1 %v4034_v12 }
 0x363   :  { %v2421_v2 = vpop.f32.mrb[32].mxu0  ;;  %v2567_v18 = vpop.f32.mrb[32].mxu1 }
 0x364   :  { %v3495_v22 = vadd.f32 %v2421_v2, %v4484_v13  ;;  %v3511_v25 = vadd.f32 %v2567_v18, %v4487_v14  ;;  %v2423_v28 = vpop.f32.mrb[33].mxu0  ;;  %v2569_v29 = vpop.f32.mrb[33].mxu1 }
 0x365   :  { %v3496_v17 = vadd.f32 %v2423_v28, %v4490_v15  ;;  %v3512_v20 = vadd.f32 %v2569_v29, %v4493_v16  ;;  %v2425_v23 = vpop.f32.mrb[34].mxu0  ;;  %v2571_v30 = vpop.f32.mrb[34].mxu1 }
 0x366   :  { %v3497_v19 = vadd.f32 %v2425_v23, %v4484_v13  ;;  %v3513_v33 = vadd.f32 %v2571_v30, %v4487_v14  ;;  %v2427_v26 = vpop.f32.mrb[35].mxu0  ;;  %v2573_v36 = vpop.f32.mrb[35].mxu1  ;;  %v2606_v39 = vmax.f32 %v3495_v22, 0.0  ;;  %v2608_v21 = vmax.f32 %v3511_v25, 0.0 }
 0x367   :  { %v3498_v37 = vadd.f32 %v2427_v26, %v4490_v15  ;;  %v3514_v38 = vadd.f32 %v2573_v36, %v4493_v16  ;;  %v2607_v8 = vmax.f32 %v3496_v17, 0.0  ;;  %v2609_v54 = vmax.f32 %v3512_v20, 0.0 }
 0x368   :  { %v2610_v44 = vmax.f32 %v3497_v19, 0.0  ;;  %v2612_v45 = vmax.f32 %v3513_v33, 0.0 }
 0x369   :  { %v2611_v46 = vmax.f32 %v3498_v37, 0.0  ;;  %v2613_v48 = vmax.f32 %v3514_v38, 0.0 }
 0x36a   :  { %v2638_v50 = vpack.c.bf16 %v2610_v44, %v2606_v39  ;;  %v2640_v51 = vpack.c.bf16 %v2612_v45, %v2608_v21 }
 0x36b   :  { %v2639_v52 = vpack.c.bf16 %v2611_v46, %v2607_v8  ;;  %v2641_v34 = vpack.c.bf16 %v2613_v48, %v2609_v54  ;;  %v2431_v53 = vpop.f32.mrb[36].mxu0  ;;  %v2577_v55 = vpop.f32.mrb[36].mxu1 }
 0x36c   :  { %v3499_v56 = vadd.f32 %v2431_v53, %v4484_v13  ;;  %v3515_v57 = vadd.f32 %v2577_v55, %v4487_v14  ;;  %v2433_v35 = vpop.f32.mrb[37].mxu0  ;;  %v2579_v59 = vpop.f32.mrb[37].mxu1 }
 0x36d   :  { %v3500_v31 = vadd.f32 %v2433_v35, %v4490_v15  ;;  %v3516_v40 = vadd.f32 %v2579_v59, %v4493_v16  ;;  %v2435_v41 = vpop.f32.mrb[38].mxu0  ;;  %v2581_v58 = vpop.f32.mrb[38].mxu1  ;;  %2949 = vmatprep.mubr.bf16.mxu0 %v2639_v52  ;;  %3014 = vmatprep.mubr.bf16.mxu1 %v2641_v34 }
 0x36e   :  { %v3501_v60 = vadd.f32 %v2435_v41, %v4484_v13  ;;  %v3517_v61 = vadd.f32 %v2581_v58, %v4487_v14  ;;  %v2437_v10 = vpop.f32.mrb[39].mxu0  ;;  %v2583_v49 = vpop.f32.mrb[39].mxu1  ;;  %2950 = vmatmul.mubr.bf16.vlgmr.msra.gmra.mrb[48].mxu0 %v2638_v50  ;;  %3015 = vmatmul.mubr.bf16.vlgmr.msra.gmra.mrb[48].mxu1 %v2640_v51  ;;  %v2614_v0 = vmax.f32 %v3499_v56, 0.0  ;;  %v2616_v1 = vmax.f32 %v3515_v57, 0.0 }
 0x36f   :  { %v3502_v62 = vadd.f32 %v2437_v10, %v4490_v15  ;;  %v3518_v43 = vadd.f32 %v2583_v49, %v4493_v16  ;;  %v2615_v47 = vmax.f32 %v3500_v31, 0.0  ;;  %v2617_v27 = vmax.f32 %v3516_v40, 0.0 }
 0x370   :  { %v2618_v32 = vmax.f32 %v3501_v60, 0.0  ;;  %v2620_v3 = vmax.f32 %v3517_v61, 0.0 }
 0x371   :  { %v2619_v4 = vmax.f32 %v3502_v62, 0.0  ;;  %v2621_v5 = vmax.f32 %v3518_v43, 0.0 }
 0x372   :  { %v2642_v6 = vpack.c.bf16 %v2618_v32, %v2614_v0  ;;  %v2644_v7 = vpack.c.bf16 %v2620_v3, %v2616_v1 }
 0x373   :  { %v2643_v24 = vpack.c.bf16 %v2619_v4, %v2615_v47  ;;  %v2645_v63 = vpack.c.bf16 %v2621_v5, %v2617_v27  ;;  %v2441_v9 = vpop.f32.mrb[40].mxu0  ;;  %v2587_v11 = vpop.f32.mrb[40].mxu1 }
 0x374   :  { %v3503_v12 = vadd.f32 %v2441_v9, %v4484_v13  ;;  %v3519_v42 = vadd.f32 %v2587_v11, %v4487_v14  ;;  %v2443_v2 = vpop.f32.mrb[41].mxu0  ;;  %v2589_v18 = vpop.f32.mrb[41].mxu1 }
 0x375   :  { %v3504_v22 = vadd.f32 %v2443_v2, %v4490_v15  ;;  %v3520_v25 = vadd.f32 %v2589_v18, %v4493_v16  ;;  %v2445_v28 = vpop.f32.mrb[42].mxu0  ;;  %v2591_v29 = vpop.f32.mrb[42].mxu1  ;;  %2957 = vmatprep.mubr.bf16.mxu0 %v2643_v24  ;;  %3022 = vmatprep.mubr.bf16.mxu1 %v2645_v63 }
 0x376   :  { %v3505_v17 = vadd.f32 %v2445_v28, %v4484_v13  ;;  %v3521_v20 = vadd.f32 %v2591_v29, %v4487_v14  ;;  %v2447_v23 = vpop.f32.mrb[43].mxu0  ;;  %v2593_v30 = vpop.f32.mrb[43].mxu1  ;;  %2958 = vmatmul.mubr.bf16.gmra.mrb[52].mxu0 %v2642_v6  ;;  %3023 = vmatmul.mubr.bf16.gmra.mrb[52].mxu1 %v2644_v7  ;;  %v2622_v26 = vmax.f32 %v3503_v12, 0.0  ;;  %v2624_v36 = vmax.f32 %v3519_v42, 0.0 }
 0x377   :  { %v3506_v19 = vadd.f32 %v2447_v23, %v4490_v15  ;;  %v3522_v33 = vadd.f32 %v2593_v30, %v4493_v16  ;;  %v2623_v39 = vmax.f32 %v3504_v22, 0.0  ;;  %v2625_v21 = vmax.f32 %v3520_v25, 0.0 }
 0x378   :  { %v2626_v37 = vmax.f32 %v3505_v17, 0.0  ;;  %v2628_v38 = vmax.f32 %v3521_v20, 0.0 }
 0x379   :  { %v2627_v44 = vmax.f32 %v3506_v19, 0.0  ;;  %v2629_v45 = vmax.f32 %v3522_v33, 0.0 }
 0x37a   :  { %v2646_v8 = vpack.c.bf16 %v2626_v37, %v2622_v26  ;;  %v2648_v54 = vpack.c.bf16 %v2628_v38, %v2624_v36 }
 0x37b   :  { %v2647_v46 = vpack.c.bf16 %v2627_v44, %v2623_v39  ;;  %v2649_v48 = vpack.c.bf16 %v2629_v45, %v2625_v21  ;;  %v2451_v50 = vpop.f32.mrb[44].mxu0  ;;  %v2597_v51 = vpop.f32.mrb[44].mxu1 }
 0x37c   :  { %v3507_v52 = vadd.f32 %v2451_v50, %v4484_v13  ;;  %v3523_v34 = vadd.f32 %v2597_v51, %v4487_v14  ;;  %v2453_v53 = vpop.f32.mrb[45].mxu0  ;;  %v2599_v55 = vpop.f32.mrb[45].mxu1 }
 0x37d   :  { %v3508_v56 = vadd.f32 %v2453_v53, %v4490_v15  ;;  %v3524_v57 = vadd.f32 %v2599_v55, %v4493_v16  ;;  %v2455_v35 = vpop.f32.mrb[46].mxu0  ;;  %v2601_v59 = vpop.f32.mrb[46].mxu1  ;;  %2965 = vmatprep.mubr.bf16.mxu0 %v2647_v46  ;;  %3030 = vmatprep.mubr.bf16.mxu1 %v2649_v48 }
 0x37e   :  { %v3509_v31 = vadd.f32 %v2455_v35, %v4484_v13  ;;  %v3525_v40 = vadd.f32 %v2601_v59, %v4487_v14  ;;  %v2457_v41 = vpop.f32.mrb[47].mxu0  ;;  %v2603_v58 = vpop.f32.mrb[47].mxu1  ;;  %2966 = vmatmul.mubr.bf16.gmra.mrb[56].mxu0 %v2646_v8  ;;  %3031 = vmatmul.mubr.bf16.gmra.mrb[56].mxu1 %v2648_v54  ;;  %v2630_v10 = vmax.f32 %v3507_v52, 0.0  ;;  %v2632_v49 = vmax.f32 %v3523_v34, 0.0 }
 0x37f   :  { %v3510_v60 = vadd.f32 %v2457_v41, %v4490_v15  ;;  %v3526_v61 = vadd.f32 %v2603_v58, %v4493_v16  ;;  %v2631_v0 = vmax.f32 %v3508_v56, 0.0  ;;  %v2633_v1 = vmax.f32 %v3524_v57, 0.0  ;;  %v4530_v16 = vld [vmem:[%s4560_s8] ss:$0 sm:$0xff]  ;;  %s4162_s8 = smov [#allocation10]  }
 0x380   :  { %v2634_v62 = vmax.f32 %v3509_v31, 0.0  ;;  %v2636_v43 = vmax.f32 %v3525_v40, 0.0  ;;  %s3060_s27 = sshll.u32 %s4162_s8, 4  ;;  %s3061_s27 = int_to_ptr.vmem [resolvable:$true] %s3060_s27 }
 0x381   :  { %v2635_v32 = vmax.f32 %v3510_v60, 0.0  ;;  %v2637_v3 = vmax.f32 %v3526_v61, 0.0  ;;  %s4123_s28 = scalar_lea.vmem %s3061_s27, 1024  ;;  %p4128_p5 = scmp.lt.s32.totalorder %s3061_s27, %s3061_s27 }
 0x382   :  { %v2650_v47 = vpack.c.bf16 %v2634_v62, %v2630_v10  ;;  %v2652_v13 = vpack.c.bf16 %v2636_v43, %v2632_v49  ;;  %p4124_p4 = scmp.ne.s32.totalorder %s3061_s27, %s4123_s28  ;;  %p4129_p6 = scmp.lt.s32.totalorder %s4123_s28, %s4123_s28 }
 0x383   :  { %v2651_v27 = vpack.c.bf16 %v2635_v32, %v2631_v0  ;;  %v2653_v14 = vpack.c.bf16 %v2637_v3, %v2633_v1 }
 0x384   :  { %p4130_p7 = por %p4129_p6, %p4128_p5 }
 0x385   :  { %2973 = vmatprep.mubr.bf16.mxu0 %v2651_v27  ;;  %3038 = vmatprep.mubr.bf16.mxu1 %v2653_v14 }
 0x386   :  { %2974 = vmatmul.mubr.bf16.gmra.mrb[60].mxu0 %v2650_v47  ;;  %3039 = vmatmul.mubr.bf16.gmra.mrb[60].mxu1 %v2652_v13  ;;  %p4131_p8 = pnand %p4130_p7, %p4124_p4 }
 0x441   :  { %v3399_v4 = vpop.f32.mrb[48].mxu0  ;;  %v3439_v15 = vpop.f32.mrb[48].mxu1 }
 0x442   :  { %v3400_v5 = vpop.f32.mrb[49].mxu0  ;;  %v3440_v6 = vpop.f32.mrb[49].mxu1 }
 0x443   :  { %v3401_v7 = vadd.f32 %v3400_v5, %v3399_v4  ;;  %v3441_v24 = vadd.f32 %v3440_v6, %v3439_v15  ;;  %v3402_v63 = vpop.f32.mrb[50].mxu0  ;;  %v3442_v9 = vpop.f32.mrb[50].mxu1 }
 0x444   :  { %v3403_v11 = vpop.f32.mrb[51].mxu0  ;;  %v3443_v12 = vpop.f32.mrb[51].mxu1 }
 0x445   :  { %v2952_v42 = vadd.f32 %v3401_v7, %v4530_v16  ;;  %v3404_v2 = vadd.f32 %v3403_v11, %v3402_v63  ;;  %v3444_v18 = vadd.f32 %v3443_v12, %v3442_v9 }
 0x447   :  { %v3017_v22 = vadd.f32 %v3441_v24, %v2952_v42  ;;  %v2955_v25 = vadd.f32 %v3404_v2, %v4530_v16 }
 0x449   :  { %3047 = vst [vmem:[#allocation10] sm:$0xff] %v3017_v22  ;;  %v3020_v28 = vadd.f32 %v3444_v18, %v2955_v25  ;;  %v3405_v29 = vpop.f32.mrb[52].mxu0  ;;  %v3445_v17 = vpop.f32.mrb[52].mxu1 }
 0x44a   :  { %v3406_v20 = vpop.f32.mrb[53].mxu0  ;;  %v3446_v23 = vpop.f32.mrb[53].mxu1 }
 0x44b   :  { %3048 = vst [vmem:[#allocation10 + $0x8] sm:$0xff] %v3020_v28  ;;  %v3407_v30 = vadd.f32 %v3406_v20, %v3405_v29  ;;  %v3447_v19 = vadd.f32 %v3446_v23, %v3445_v17  ;;  %v3408_v33 = vpop.f32.mrb[54].mxu0  ;;  %v3448_v26 = vpop.f32.mrb[54].mxu1 }
 0x44c   :  { %v3409_v36 = vpop.f32.mrb[55].mxu0  ;;  %v3449_v37 = vpop.f32.mrb[55].mxu1 }
 0x44d   :  { %v2960_v38 = vadd.f32 %v3407_v30, %v4530_v16  ;;  %v3410_v39 = vadd.f32 %v3409_v36, %v3408_v33  ;;  %v3450_v21 = vadd.f32 %v3449_v37, %v3448_v26 }
 0x44f   :  { %v3025_v44 = vadd.f32 %v3447_v19, %v2960_v38  ;;  %v2963_v45 = vadd.f32 %v3410_v39, %v4530_v16 }
 0x451   :  { %3049 = vst [vmem:[#allocation10 + $0x10] sm:$0xff] %v3025_v44  ;;  %v3028_v8 = vadd.f32 %v3450_v21, %v2963_v45  ;;  %v3411_v54 = vpop.f32.mrb[56].mxu0  ;;  %v3451_v46 = vpop.f32.mrb[56].mxu1 }
 0x452   :  { %v3412_v48 = vpop.f32.mrb[57].mxu0  ;;  %v3452_v50 = vpop.f32.mrb[57].mxu1 }
 0x453   :  { %3050 = vst [vmem:[#allocation10 + $0x18] sm:$0xff] %v3028_v8  ;;  %v3413_v51 = vadd.f32 %v3412_v48, %v3411_v54  ;;  %v3453_v52 = vadd.f32 %v3452_v50, %v3451_v46  ;;  %v3414_v34 = vpop.f32.mrb[58].mxu0  ;;  %v3454_v53 = vpop.f32.mrb[58].mxu1 }
 0x454   :  { %v3415_v55 = vpop.f32.mrb[59].mxu0  ;;  %v3455_v56 = vpop.f32.mrb[59].mxu1 }
 0x455   :  { %v2968_v57 = vadd.f32 %v3413_v51, %v4530_v16  ;;  %v3416_v35 = vadd.f32 %v3415_v55, %v3414_v34  ;;  %v3456_v59 = vadd.f32 %v3455_v56, %v3454_v53 }
 0x457   :  { %v3033_v31 = vadd.f32 %v3453_v52, %v2968_v57  ;;  %v2971_v40 = vadd.f32 %v3416_v35, %v4530_v16 }
 0x459   :  { %3051 = vst [vmem:[#allocation10 + $0x20] sm:$0xff] %v3033_v31  ;;  %v3036_v41 = vadd.f32 %v3456_v59, %v2971_v40  ;;  %v3417_v58 = vpop.f32.mrb[60].mxu0  ;;  %v3457_v60 = vpop.f32.mrb[60].mxu1 }
 0x45a   :  { %v3418_v61 = vpop.f32.mrb[61].mxu0  ;;  %v3458_v10 = vpop.f32.mrb[61].mxu1 }
 0x45b   :  { %3052 = vst [vmem:[#allocation10 + $0x28] sm:$0xff] %v3036_v41  ;;  %v3419_v49 = vadd.f32 %v3418_v61, %v3417_v58  ;;  %v3459_v62 = vadd.f32 %v3458_v10, %v3457_v60  ;;  %v3420_v43 = vpop.f32.mrb[62].mxu0  ;;  %v3460_v0 = vpop.f32.mrb[62].mxu1 }
 0x45c   :  { %v3421_v1 = vpop.f32.mrb[63].mxu0  ;;  %v3461_v32 = vpop.f32.mrb[63].mxu1 }
 0x45d   :  { %v2976_v3 = vadd.f32 %v3419_v49, %v4530_v16  ;;  %v3422_v47 = vadd.f32 %v3421_v1, %v3420_v43  ;;  %v3462_v13 = vadd.f32 %v3461_v32, %v3460_v0 }
 0x45f   :  { %v3041_v27 = vadd.f32 %v3459_v62, %v2976_v3  ;;  %v2979_v14 = vadd.f32 %v3422_v47, %v4530_v16 }
 0x461   :  { %3053 = vst [vmem:[#allocation10 + $0x30] sm:$0xff] %v3041_v27  ;;  %v3044_v4 = vadd.f32 %v3462_v13, %v2979_v14 }
 0x463   :  { %3054 = vst [vmem:[#allocation10 + $0x38] sm:$0xff] %v3044_v4 }
 0x464   :  { %4134 = shalt.err (!%p4131_p8)
}
 0x465   :  { %s4135_s11 = scalar_lea.hbm %s4561_s9, 1024 }
 0x466   :  { %p4136_p9 = scmp.ne.s32.totalorder %s4561_s9, %s4135_s11  ;;  %p4139_p10 = scmp.lt.u32.totalorder %s4135_s11, %s4561_s9 }
 0x468   :  { %p4141_p11 = pnand %p4139_p10, %p4136_p9 }
 0x46a   :  { %4144 = shalt.err (!%p4141_p11)
}
 0x46b   :  { %s4163_s5 = smov 128   ;;  %s4164_s21 = smov 8  }
 0x46c   :  { %3066 = dma.vmem_to_hbm [thread:$0]  %s3061_s27, 1024, %s4561_s9, [#allocation4], %s4163_s5, %s4163_s5, %s4164_s21  }
 0x46d   :  { %4151 = dma.done.wait [#allocation4], 1024  }
 0x46e   :  { %4152 = vsyncadd [#allocation4], 4294966272 }
 0x46f   :  { %3070 = vsyncpa [#allocation3], 1 }
 0x470   :  { %3071 = vsyncpa [#allocation6], 1 }
 0x471   :  { %3072 = vsyncpa [#allocation9], 1 }
 0x472   :  { %3073 = vsyncpa [#allocation4], 1 }

</bundles_post_ra>
